<compile_context>
chip_gen: v5e
topology: v5e:2x2
jax: 0.10.0
libtpu: 0.0.40
codegen_flags: <defaults>
</compile_context>

<pallas_src>
import math
from functools import partial

import jax
import jax.numpy as jnp
from jax import lax
from jax.experimental import pallas as pl
from jax.experimental.pallas import tpu as pltpu


# ---------------------------------------------------------------------------
# Kernels
# ---------------------------------------------------------------------------
def _grouped_conv_kernel(x_ref, w_ref, b_ref, o_ref, *, K, stride, TH, Wo,
                         Cin_blk, Cout_blk, matmul_dtype):
    """Per-tap-accumulate grouped conv for one (group-block, batch, row-band).

    x_ref: (Hp, Wp, Cin_blk)         padded input, channels-last, one group block
    w_ref: (K*K, Cin_blk, Cout_blk)  block-diagonal fused (lk+sk) tap weights
    b_ref: (1, Cout_blk)             fused bias
    o_ref: (TH, Wo, Cout_blk)        one output row band
    """
    t = pl.program_id(2)
    row0 = pl.multiple_of(t * (TH * stride), TH * stride)
    M = TH * Wo

    def kh_body(kh, acc):
        for kw in range(K):                      # unrolled: static lane offsets
            if stride == 1:
                win = x_ref[pl.ds(row0 + kh, TH), kw:kw + Wo, :]
            else:
                # strided reads rather than load-then-decimate
                win = x_ref[pl.ds(row0 + kh, TH, stride=stride),
                            pl.ds(kw, Wo, stride=stride), :]
            lhs = win.reshape(M, Cin_blk)        # minor (lane) dim unchanged
            rhs = w_ref[kh * K + kw]             # (Cin_blk, Cout_blk)
            if matmul_dtype is not None:
                lhs = lhs.astype(matmul_dtype)   # w_ref was pre-cast in wrapper
            acc = acc + jnp.dot(lhs, rhs, preferred_element_type=jnp.float32)
        return acc

    acc = lax.fori_loop(0, K, kh_body, jnp.zeros((M, Cout_blk), jnp.float32))
    acc = acc + b_ref[...].astype(jnp.float32)
    o_ref[...] = acc.reshape(TH, Wo, Cout_blk).astype(o_ref.dtype)


def _depthwise_conv_kernel(x_ref, w_ref, b_ref, o_ref, *, K, stride, TH, Wo, Cb):
    """Pure-VPU shifted-FMA depthwise conv (channels on the 128-lane axis).

    x_ref: (Hp, Wp, Cb)   padded input slab, channels-last
    w_ref: (K*K, 1, Cb)   per-channel fused tap weights
    b_ref: (1, 1, Cb)     fused bias
    o_ref: (TH, Wo, Cb)   one output row band
    """
    t = pl.program_id(2)
    row0 = pl.multiple_of(t * (TH * stride), TH * stride)

    def kh_body(kh, acc):
        for kw in range(K):
            if stride == 1:
                win = x_ref[pl.ds(row0 + kh, TH), kw:kw + Wo, :]
            else:
                win = x_ref[pl.ds(row0 + kh, TH, stride=stride),
                            pl.ds(kw, Wo, stride=stride), :]
            wt = w_ref[kh * K + kw]              # (1, Cb) -> broadcast over TH, Wo
            acc = acc + win.astype(jnp.float32) * wt.astype(jnp.float32)
        return acc

    acc = lax.fori_loop(0, K, kh_body, jnp.zeros((TH, Wo, Cb), jnp.float32))
    acc = acc + b_ref[...].astype(jnp.float32)
    o_ref[...] = acc.astype(o_ref.dtype)


# ---------------------------------------------------------------------------
# Tiling helpers
# ---------------------------------------------------------------------------
def _vmem_limit_bytes():
    """Generation-aware VMEM budget (64 MiB on v7x vs 128 MiB on v5e/v6e)."""
    try:
        cap = int(pltpu.get_tpu_info().vmem_capacity_bytes)
    except Exception:
        cap = 64 * 2 ** 20            # conservative fallback (v7x per-core VMEM)
    return min(int(cap * 0.75), 100 * 2 ** 20)


def _pick_row_band(Ho, Wo, lanes, itemsize, fixed_bytes, budget_bytes):
    """Output rows per band sized to the VMEM budget; keeps TH*Wo % 8 == 0."""
    per_row = Wo * lanes * (3 * itemsize + 8)   # out (x2 pipeline) + f32 acc + slack
    avail = max(budget_bytes - fixed_bytes, per_row)
    th = max(1, int(avail // per_row))
    r = 8 // math.gcd(Wo, 8)                    # smallest TH making TH*Wo % 8 == 0
    th = max(r, (th // r) * r)
    th_cap = pl.cdiv(Ho, r) * r                 # never more than one full sweep
    return min(th, th_cap)


def _pick_group_block(groups, cin_g, cout_g):
    """Groups packed per grid step: fill >=128 output lanes when possible."""
    divs = [d for d in range(1, groups + 1) if groups % d == 0]
    for d in divs:
        if d * cout_g >= 128:
            return d
    best = 1
    for d in divs:                              # cap block-diagonal contraction waste
        if d * cin_g <= 512:
            best = d
    return best


# ---------------------------------------------------------------------------
# Wrapper
# ---------------------------------------------------------------------------
def reparam_large_kernel_conv(x_nchw, lk_w, sk_w, lk_b, sk_b, *,
                              kernel_size, small_kernel, stride, groups,
                              matmul_dtype=None):
    """Unfused ReparamLargeKernelConv forward.  x_nchw: (N, Cin, H, W), OIHW weights."""
    N, Cin, H, W = x_nchw.shape
    Cout = lk_w.shape[0]
    K, k = kernel_size, small_kernel
    assert Cin % groups == 0 and Cout % groups == 0
    Cin_g, Cout_g = Cin // groups, Cout // groups
    p = K // 2
    Ho = (H + 2 * p - K) // stride + 1
    Wo = (W + 2 * p - K) // stride + 1
    assert (K - k) % 2 == 0, "kernel centers must align (K - k must be even)"
    assert (H + 2 * (k // 2) - k) // stride + 1 == Ho, "branch Ho mismatch"
    assert (W + 2 * (k // 2) - k) // stride + 1 == Wo, "branch Wo mismatch"

    # ---- fold the small-kernel branch into the large one (== module.fuse()) --
    pad_k = (K - k) // 2
    w_eff = lk_w + jnp.pad(sk_w, ((0, 0), (0, 0), (pad_k, pad_k), (pad_k, pad_k)))
    b_eff = lk_b + sk_b

    dtype = x_nchw.dtype
    itemsize = jnp.dtype(dtype).itemsize
    Wp = W + 2 * p
    vmem_limit = _vmem_limit_bytes()
    band_budget = vmem_limit // 2
    depthwise = (groups == Cin) and (Cin == Cout)

    if depthwise:
        # ------------------- depthwise: pure-VPU shifted FMA ------------------
        C = Cin
        Cb = 128 if (C % 128 == 0 and C > 128) else C
        n_cb = C // Cb
        fixed = 2 * (H + 2 * p + 8 * stride) * Wp * Cb * itemsize \
            + 2 * (K * K) * 8 * max(Cb, 128) * itemsize
        TH = _pick_row_band(Ho, Wo, Cb, itemsize, fixed, band_budget)
        n_bands = pl.cdiv(Ho, TH)
        Ho_pad = n_bands * TH
        Hp_need = (Ho_pad - 1) * stride + K
        Hp_arr = max(H + 2 * p, Hp_need)
        pad_bot = Hp_arr - (H + 2 * p)

        x_pad = jnp.pad(x_nchw, ((0, 0), (0, 0), (p, p + pad_bot), (p, p)))
        x_cl = x_pad.transpose(0, 2, 3, 1)                     # (N, Hp_arr, Wp, C)
        w_dw = w_eff.reshape(C, K * K).transpose(1, 0).reshape(K * K, 1, C)
        b_dw = b_eff.reshape(1, 1, C)

        kernel = partial(_depthwise_conv_kernel, K=K, stride=stride,
                         TH=TH, Wo=Wo, Cb=Cb)
        out = pl.pallas_call(
            kernel,
            out_shape=jax.ShapeDtypeStruct((N, Ho_pad, Wo, C), dtype),
            grid=(n_cb, N, n_bands),
            in_specs=[
                pl.BlockSpec((None, Hp_arr, Wp, Cb), lambda c, n, t: (n, 0, 0, c)),
                pl.BlockSpec((K * K, 1, Cb), lambda c, n, t: (0, 0, c)),
                pl.BlockSpec((1, 1, Cb), lambda c, n, t: (0, 0, c)),
            ],
            out_specs=pl.BlockSpec((None, TH, Wo, Cb), lambda c, n, t: (n, t, 0, c)),
            compiler_params=pltpu.CompilerParams(
                dimension_semantics=("parallel", "parallel", "parallel"),
                vmem_limit_bytes=vmem_limit),
        )(x_cl, w_dw, b_dw)
        return out.transpose(0, 3, 1, 2)[:, :, :Ho, :]

    # ----------------- grouped / dense: per-tap MXU accumulate ----------------
    GB = _pick_group_block(groups, Cin_g, Cout_g)
    n_gb = groups // GB
    Cin_blk, Cout_blk = GB * Cin_g, GB * Cout_g

    fixed = 2 * (H + 2 * p + 8 * stride) * Wp * Cin_blk * itemsize \
        + 2 * (K * K) * max(Cin_blk, 8) * max(Cout_blk, 128) * itemsize
    TH = _pick_row_band(Ho, Wo, Cout_blk, itemsize, fixed, band_budget)
    n_bands = pl.cdiv(Ho, TH)
    Ho_pad = n_bands * TH
    Hp_need = (Ho_pad - 1) * stride + K
    Hp_arr = max(H + 2 * p, Hp_need)
    pad_bot = Hp_arr - (H + 2 * p)

    x_pad = jnp.pad(x_nchw, ((0, 0), (0, 0), (p, p + pad_bot), (p, p)))
    # (N, n_gb, Hp_arr, Wp, Cin_blk), channels-last within a group block
    x_gb = x_pad.reshape(N, n_gb, Cin_blk, Hp_arr, Wp).transpose(0, 1, 3, 4, 2)

    # Block-diagonal fused tap weights: (n_gb, K*K, Cin_blk, Cout_blk)
    w_taps = (w_eff.reshape(n_gb, GB, Cout_g, Cin_g, K, K)
              .transpose(0, 4, 5, 1, 3, 2))                    # (gb,kh,kw,g,ci,co)
    eye = jnp.eye(GB, dtype=w_eff.dtype)
    w_mat = jnp.einsum('nhwgic,gf->nhwgifc', w_taps, eye)
    w_mat = w_mat.reshape(n_gb, K * K, Cin_blk, Cout_blk)
    if matmul_dtype is not None:
        w_mat = w_mat.astype(matmul_dtype)                     # bf16 MXU fast path
    b_mat = b_eff.reshape(n_gb, 1, Cout_blk)

    kernel = partial(_grouped_conv_kernel, K=K, stride=stride, TH=TH, Wo=Wo,
                     Cin_blk=Cin_blk, Cout_blk=Cout_blk, matmul_dtype=matmul_dtype)
    out = pl.pallas_call(
        kernel,
        out_shape=jax.ShapeDtypeStruct((N, n_gb, Ho_pad, Wo, Cout_blk), dtype),
        # group-block outermost => weights VMEM-resident over the inner sweep;
        # x block constant across the innermost band axis.
        grid=(n_gb, N, n_bands),
        in_specs=[
            pl.BlockSpec((None, None, Hp_arr, Wp, Cin_blk),
                         lambda gb, n, t: (n, gb, 0, 0, 0)),
            pl.BlockSpec((None, K * K, Cin_blk, Cout_blk),
                         lambda gb, n, t: (gb, 0, 0, 0)),
            pl.BlockSpec((None, 1, Cout_blk), lambda gb, n, t: (gb, 0, 0)),
        ],
        out_specs=pl.BlockSpec((None, None, TH, Wo, Cout_blk),
                               lambda gb, n, t: (n, gb, t, 0, 0)),
        compiler_params=pltpu.CompilerParams(
            dimension_semantics=("parallel", "parallel", "parallel"),
            vmem_limit_bytes=vmem_limit),
    )(x_gb, w_mat, b_mat)

    out = out.transpose(0, 1, 4, 2, 3).reshape(N, Cout, Ho_pad, Wo)
    return out[:, :, :Ho, :]


# ---------------------------------------------------------------------------
# Pure-JAX reference (matches the torch semantics, NCHW / OIHW)
# ---------------------------------------------------------------------------
def _ref_forward(x, lk_w, sk_w, lk_b, sk_b, *, kernel_size, small_kernel,
                 stride, groups):
    def conv(w, kk):
        q = kk // 2
        return lax.conv_general_dilated(
            x, w, window_strides=(stride, stride), padding=((q, q), (q, q)),
            dimension_numbers=("NCHW", "OIHW", "NCHW"),
            feature_group_count=groups)
    lk = conv(lk_w, kernel_size)
    sk = conv(sk_w, small_kernel)
    return lk + lk_b.reshape(1, -1, 1, 1) + sk + sk_b.reshape(1, -1, 1, 1)


# ---------------------------------------------------------------------------
# Self-test
# ---------------------------------------------------------------------------
if __name__ == "__main__":
    def make_case(key, N, Cin, Cout, K, k, groups, H, W):
        kx, klk, ksk, kb1, kb2 = jax.random.split(key, 5)
        x = jax.random.normal(kx, (N, Cin, H, W), jnp.float32)
        lk_w = jax.random.normal(klk, (Cout, Cin // groups, K, K), jnp.float32) * 0.05
        sk_w = jax.random.normal(ksk, (Cout, Cin // groups, k, k), jnp.float32) * 0.05
        lk_b = jax.random.normal(kb1, (Cout,), jnp.float32) * 0.1
        sk_b = jax.random.normal(kb2, (Cout,), jnp.float32) * 0.1
        return x, lk_w, sk_w, lk_b, sk_b

    key = jax.random.PRNGKey(0)
    k1, k2 = jax.random.split(key)

    # Case 1: grouped conv (groups < channels) -> block-diagonal MXU path.
    cfg1 = dict(kernel_size=7, small_kernel=3, stride=1, groups=2)
    x1, lkw1, skw1, lkb1, skb1 = make_case(k1, 2, 8, 8, 7, 3, 2, 16, 16)
    out1 = jax.block_until_ready(
        reparam_large_kernel_conv(x1, lkw1, skw1, lkb1, skb1, **cfg1))
    ref1 = _ref_forward(x1, lkw1, skw1, lkb1, skb1, **cfg1)
    assert out1.shape == ref1.shape == (2, 8, 16, 16)
    assert jnp.allclose(out1, ref1, atol=5e-4, rtol=5e-4), (
        f"grouped max err {jnp.max(jnp.abs(out1 - ref1))}")

    # Case 1b: same config with the bf16 MXU fast path (v6e/v7x feedback).
    out1b = jax.block_until_ready(
        reparam_large_kernel_conv(x1, lkw1, skw1, lkb1, skb1,
                                  matmul_dtype=jnp.bfloat16, **cfg1))
    assert jnp.allclose(out1b, ref1, atol=3e-2, rtol=3e-2), (
        f"bf16 grouped max err {jnp.max(jnp.abs(out1b - ref1))}")

    # Case 2: depthwise (groups == channels) -> pure-VPU shifted-FMA path.
    cfg2 = dict(kernel_size=7, small_kernel=3, stride=1, groups=8)
    x2, lkw2, skw2, lkb2, skb2 = make_case(k2, 2, 8, 8, 7, 3, 8, 16, 16)
    out2 = jax.block_until_ready(
        reparam_large_kernel_conv(x2, lkw2, skw2, lkb2, skb2, **cfg2))
    ref2 = _ref_forward(x2, lkw2, skw2, lkb2, skb2, **cfg2)
    assert out2.shape == ref2.shape == (2, 8, 16, 16)
    assert jnp.allclose(out2, ref2, atol=5e-4, rtol=5e-4), (
        f"depthwise max err {jnp.max(jnp.abs(out2 - ref2))}")

    print("KERNEL_OK")
</pallas_src>

<mosaic_0001>
module attributes {stable_mosaic.version = 11 : i64} {
  func.func @_grouped_conv_kernel(%arg0: i32, %arg1: i32, %arg2: i32, %arg3: memref<1x1x22x22x8xf32, #tpu.memory_space<vmem>>, %arg4: memref<1x49x8x8xf32, #tpu.memory_space<vmem>>, %arg5: memref<1x1x8xf32, #tpu.memory_space<vmem>>, %arg6: memref<1x1x16x16x8xf32, #tpu.memory_space<vmem>>) attributes {dimension_semantics = [#tpu.dimension_semantics<parallel>, #tpu.dimension_semantics<parallel>, #tpu.dimension_semantics<parallel>], iteration_bounds = array<i64: 1, 2, 1>, scalar_prefetch = 0 : i64, scratch_operands = 0 : i64, tpu.core_type = #tpu.core_type<tc>, window_params = [{transform_indices = @transform_0, window_bounds = array<i64: 1, 1, 22, 22, 8>}, {transform_indices = @transform_1, window_bounds = array<i64: 1, 49, 8, 8>}, {transform_indices = @transform_2, window_bounds = array<i64: 1, 1, 8>}, {transform_indices = @transform_3, window_bounds = array<i64: 1, 1, 16, 16, 8>}]} {
    %c16_i32 = arith.constant 16 : i32
    %0 = arith.muli %arg2, %c16_i32 : i32
    %1 = tpu.assume_multiple %0, 16 : i32
    %cst = arith.constant 0.000000e+00 : f32
    %2 = vector.broadcast %cst : f32 to vector<256x8xf32>
    %c0_i32 = arith.constant 0 : i32
    %c7_i32 = arith.constant 7 : i32
    %3 = arith.addi %c0_i32, %c7_i32 : i32
    %c1_i32 = arith.constant 1 : i32
    %4 = scf.for %arg7 = %c0_i32 to %3 step %c1_i32 iter_args(%arg8 = %2) -> (vector<256x8xf32>)  : i32 {
      %13 = arith.addi %1, %arg7 : i32
      %c0_8 = arith.constant 0 : index
      %c0_9 = arith.constant 0 : index
      %14 = arith.index_cast %13 : i32 to index
      %c0_10 = arith.constant 0 : index
      %c0_11 = arith.constant 0 : index
      %15 = vector.load %arg3[%c0_8, %c0_9, %14, %c0_10, %c0_11] : memref<1x1x22x22x8xf32, #tpu.memory_space<vmem>>, vector<1x1x16x16x8xf32>
      %16 = vector.shape_cast %15 : vector<1x1x16x16x8xf32> to vector<16x16x8xf32>
      %17 = vector.shape_cast %16 : vector<16x16x8xf32> to vector<256x8xf32>
      %c7_i32_12 = arith.constant 7 : i32
      %18 = arith.muli %arg7, %c7_i32_12 : i32
      %c0_i32_13 = arith.constant 0 : i32
      %19 = arith.addi %18, %c0_i32_13 : i32
      %c0_14 = arith.constant 0 : index
      %20 = arith.index_cast %19 : i32 to index
      %c0_15 = arith.constant 0 : index
      %c0_16 = arith.constant 0 : index
      %21 = vector.load %arg4[%c0_14, %20, %c0_15, %c0_16] : memref<1x49x8x8xf32, #tpu.memory_space<vmem>>, vector<1x1x8x8xf32>
      %22 = vector.shape_cast %21 : vector<1x1x8x8xf32> to vector<8x8xf32>
      %cst_17 = arith.constant dense<0.000000e+00> : vector<256x8xf32>
      %23 = tpu.matmul %17, %22, %cst_17 {dimension_numbers = #tpu.dot_dimension_numbers<[1], [0], [0], [1], [0, 0, 1, 1], [], []>} : vector<256x8xf32>, vector<8x8xf32>, vector<256x8xf32> -> vector<256x8xf32>
      %24 = arith.addf %arg8, %23 : vector<256x8xf32>
      %25 = arith.addi %1, %arg7 : i32
      %c0_18 = arith.constant 0 : index
      %c0_19 = arith.constant 0 : index
      %26 = arith.index_cast %25 : i32 to index
      %c1 = arith.constant 1 : index
      %c0_20 = arith.constant 0 : index
      %27 = vector.load %arg3[%c0_18, %c0_19, %26, %c1, %c0_20] : memref<1x1x22x22x8xf32, #tpu.memory_space<vmem>>, vector<1x1x16x16x8xf32>
      %28 = vector.shape_cast %27 : vector<1x1x16x16x8xf32> to vector<16x16x8xf32>
      %29 = vector.shape_cast %28 : vector<16x16x8xf32> to vector<256x8xf32>
      %c7_i32_21 = arith.constant 7 : i32
      %30 = arith.muli %arg7, %c7_i32_21 : i32
      %c1_i32_22 = arith.constant 1 : i32
      %31 = arith.addi %30, %c1_i32_22 : i32
      %c0_23 = arith.constant 0 : index
      %32 = arith.index_cast %31 : i32 to index
      %c0_24 = arith.constant 0 : index
      %c0_25 = arith.constant 0 : index
      %33 = vector.load %arg4[%c0_23, %32, %c0_24, %c0_25] : memref<1x49x8x8xf32, #tpu.memory_space<vmem>>, vector<1x1x8x8xf32>
      %34 = vector.shape_cast %33 : vector<1x1x8x8xf32> to vector<8x8xf32>
      %cst_26 = arith.constant dense<0.000000e+00> : vector<256x8xf32>
      %35 = tpu.matmul %29, %34, %cst_26 {dimension_numbers = #tpu.dot_dimension_numbers<[1], [0], [0], [1], [0, 0, 1, 1], [], []>} : vector<256x8xf32>, vector<8x8xf32>, vector<256x8xf32> -> vector<256x8xf32>
      %36 = arith.addf %24, %35 : vector<256x8xf32>
      %37 = arith.addi %1, %arg7 : i32
      %c0_27 = arith.constant 0 : index
      %c0_28 = arith.constant 0 : index
      %38 = arith.index_cast %37 : i32 to index
      %c2 = arith.constant 2 : index
      %c0_29 = arith.constant 0 : index
      %39 = vector.load %arg3[%c0_27, %c0_28, %38, %c2, %c0_29] : memref<1x1x22x22x8xf32, #tpu.memory_space<vmem>>, vector<1x1x16x16x8xf32>
      %40 = vector.shape_cast %39 : vector<1x1x16x16x8xf32> to vector<16x16x8xf32>
      %41 = vector.shape_cast %40 : vector<16x16x8xf32> to vector<256x8xf32>
      %c7_i32_30 = arith.constant 7 : i32
      %42 = arith.muli %arg7, %c7_i32_30 : i32
      %c2_i32 = arith.constant 2 : i32
      %43 = arith.addi %42, %c2_i32 : i32
      %c0_31 = arith.constant 0 : index
      %44 = arith.index_cast %43 : i32 to index
      %c0_32 = arith.constant 0 : index
      %c0_33 = arith.constant 0 : index
      %45 = vector.load %arg4[%c0_31, %44, %c0_32, %c0_33] : memref<1x49x8x8xf32, #tpu.memory_space<vmem>>, vector<1x1x8x8xf32>
      %46 = vector.shape_cast %45 : vector<1x1x8x8xf32> to vector<8x8xf32>
      %cst_34 = arith.constant dense<0.000000e+00> : vector<256x8xf32>
      %47 = tpu.matmul %41, %46, %cst_34 {dimension_numbers = #tpu.dot_dimension_numbers<[1], [0], [0], [1], [0, 0, 1, 1], [], []>} : vector<256x8xf32>, vector<8x8xf32>, vector<256x8xf32> -> vector<256x8xf32>
      %48 = arith.addf %36, %47 : vector<256x8xf32>
      %49 = arith.addi %1, %arg7 : i32
      %c0_35 = arith.constant 0 : index
      %c0_36 = arith.constant 0 : index
      %50 = arith.index_cast %49 : i32 to index
      %c3 = arith.constant 3 : index
      %c0_37 = arith.constant 0 : index
      %51 = vector.load %arg3[%c0_35, %c0_36, %50, %c3, %c0_37] : memref<1x1x22x22x8xf32, #tpu.memory_space<vmem>>, vector<1x1x16x16x8xf32>
      %52 = vector.shape_cast %51 : vector<1x1x16x16x8xf32> to vector<16x16x8xf32>
      %53 = vector.shape_cast %52 : vector<16x16x8xf32> to vector<256x8xf32>
      %c7_i32_38 = arith.constant 7 : i32
      %54 = arith.muli %arg7, %c7_i32_38 : i32
      %c3_i32 = arith.constant 3 : i32
      %55 = arith.addi %54, %c3_i32 : i32
      %c0_39 = arith.constant 0 : index
      %56 = arith.index_cast %55 : i32 to index
      %c0_40 = arith.constant 0 : index
      %c0_41 = arith.constant 0 : index
      %57 = vector.load %arg4[%c0_39, %56, %c0_40, %c0_41] : memref<1x49x8x8xf32, #tpu.memory_space<vmem>>, vector<1x1x8x8xf32>
      %58 = vector.shape_cast %57 : vector<1x1x8x8xf32> to vector<8x8xf32>
      %cst_42 = arith.constant dense<0.000000e+00> : vector<256x8xf32>
      %59 = tpu.matmul %53, %58, %cst_42 {dimension_numbers = #tpu.dot_dimension_numbers<[1], [0], [0], [1], [0, 0, 1, 1], [], []>} : vector<256x8xf32>, vector<8x8xf32>, vector<256x8xf32> -> vector<256x8xf32>
      %60 = arith.addf %48, %59 : vector<256x8xf32>
      %61 = arith.addi %1, %arg7 : i32
      %c0_43 = arith.constant 0 : index
      %c0_44 = arith.constant 0 : index
      %62 = arith.index_cast %61 : i32 to index
      %c4 = arith.constant 4 : index
      %c0_45 = arith.constant 0 : index
      %63 = vector.load %arg3[%c0_43, %c0_44, %62, %c4, %c0_45] : memref<1x1x22x22x8xf32, #tpu.memory_space<vmem>>, vector<1x1x16x16x8xf32>
      %64 = vector.shape_cast %63 : vector<1x1x16x16x8xf32> to vector<16x16x8xf32>
      %65 = vector.shape_cast %64 : vector<16x16x8xf32> to vector<256x8xf32>
      %c7_i32_46 = arith.constant 7 : i32
      %66 = arith.muli %arg7, %c7_i32_46 : i32
      %c4_i32 = arith.constant 4 : i32
      %67 = arith.addi %66, %c4_i32 : i32
      %c0_47 = arith.constant 0 : index
      %68 = arith.index_cast %67 : i32 to index
      %c0_48 = arith.constant 0 : index
      %c0_49 = arith.constant 0 : index
      %69 = vector.load %arg4[%c0_47, %68, %c0_48, %c0_49] : memref<1x49x8x8xf32, #tpu.memory_space<vmem>>, vector<1x1x8x8xf32>
      %70 = vector.shape_cast %69 : vector<1x1x8x8xf32> to vector<8x8xf32>
      %cst_50 = arith.constant dense<0.000000e+00> : vector<256x8xf32>
      %71 = tpu.matmul %65, %70, %cst_50 {dimension_numbers = #tpu.dot_dimension_numbers<[1], [0], [0], [1], [0, 0, 1, 1], [], []>} : vector<256x8xf32>, vector<8x8xf32>, vector<256x8xf32> -> vector<256x8xf32>
      %72 = arith.addf %60, %71 : vector<256x8xf32>
      %73 = arith.addi %1, %arg7 : i32
      %c0_51 = arith.constant 0 : index
      %c0_52 = arith.constant 0 : index
      %74 = arith.index_cast %73 : i32 to index
      %c5 = arith.constant 5 : index
      %c0_53 = arith.constant 0 : index
      %75 = vector.load %arg3[%c0_51, %c0_52, %74, %c5, %c0_53] : memref<1x1x22x22x8xf32, #tpu.memory_space<vmem>>, vector<1x1x16x16x8xf32>
      %76 = vector.shape_cast %75 : vector<1x1x16x16x8xf32> to vector<16x16x8xf32>
      %77 = vector.shape_cast %76 : vector<16x16x8xf32> to vector<256x8xf32>
      %c7_i32_54 = arith.constant 7 : i32
      %78 = arith.muli %arg7, %c7_i32_54 : i32
      %c5_i32 = arith.constant 5 : i32
      %79 = arith.addi %78, %c5_i32 : i32
      %c0_55 = arith.constant 0 : index
      %80 = arith.index_cast %79 : i32 to index
      %c0_56 = arith.constant 0 : index
      %c0_57 = arith.constant 0 : index
      %81 = vector.load %arg4[%c0_55, %80, %c0_56, %c0_57] : memref<1x49x8x8xf32, #tpu.memory_space<vmem>>, vector<1x1x8x8xf32>
      %82 = vector.shape_cast %81 : vector<1x1x8x8xf32> to vector<8x8xf32>
      %cst_58 = arith.constant dense<0.000000e+00> : vector<256x8xf32>
      %83 = tpu.matmul %77, %82, %cst_58 {dimension_numbers = #tpu.dot_dimension_numbers<[1], [0], [0], [1], [0, 0, 1, 1], [], []>} : vector<256x8xf32>, vector<8x8xf32>, vector<256x8xf32> -> vector<256x8xf32>
      %84 = arith.addf %72, %83 : vector<256x8xf32>
      %85 = arith.addi %1, %arg7 : i32
      %c0_59 = arith.constant 0 : index
      %c0_60 = arith.constant 0 : index
      %86 = arith.index_cast %85 : i32 to index
      %c6 = arith.constant 6 : index
      %c0_61 = arith.constant 0 : index
      %87 = vector.load %arg3[%c0_59, %c0_60, %86, %c6, %c0_61] : memref<1x1x22x22x8xf32, #tpu.memory_space<vmem>>, vector<1x1x16x16x8xf32>
      %88 = vector.shape_cast %87 : vector<1x1x16x16x8xf32> to vector<16x16x8xf32>
      %89 = vector.shape_cast %88 : vector<16x16x8xf32> to vector<256x8xf32>
      %c7_i32_62 = arith.constant 7 : i32
      %90 = arith.muli %arg7, %c7_i32_62 : i32
      %c6_i32 = arith.constant 6 : i32
      %91 = arith.addi %90, %c6_i32 : i32
      %c0_63 = arith.constant 0 : index
      %92 = arith.index_cast %91 : i32 to index
      %c0_64 = arith.constant 0 : index
      %c0_65 = arith.constant 0 : index
      %93 = vector.load %arg4[%c0_63, %92, %c0_64, %c0_65] : memref<1x49x8x8xf32, #tpu.memory_space<vmem>>, vector<1x1x8x8xf32>
      %94 = vector.shape_cast %93 : vector<1x1x8x8xf32> to vector<8x8xf32>
      %cst_66 = arith.constant dense<0.000000e+00> : vector<256x8xf32>
      %95 = tpu.matmul %89, %94, %cst_66 {dimension_numbers = #tpu.dot_dimension_numbers<[1], [0], [0], [1], [0, 0, 1, 1], [], []>} : vector<256x8xf32>, vector<8x8xf32>, vector<256x8xf32> -> vector<256x8xf32>
      %96 = arith.addf %84, %95 : vector<256x8xf32>
      scf.yield %96 : vector<256x8xf32>
    }
    %c7_i32_0 = arith.constant 7 : i32
    %c0 = arith.constant 0 : index
    %c0_1 = arith.constant 0 : index
    %c0_2 = arith.constant 0 : index
    %5 = vector.load %arg5[%c0, %c0_1, %c0_2] : memref<1x1x8xf32, #tpu.memory_space<vmem>>, vector<1x1x8xf32>
    %6 = vector.shape_cast %5 : vector<1x1x8xf32> to vector<1x8xf32>
    %7 = vector.broadcast %6 : vector<1x8xf32> to vector<256x8xf32>
    %8 = arith.addf %4, %7 : vector<256x8xf32>
    %9 = vector.shape_cast %8 : vector<256x8xf32> to vector<16x16x8xf32>
    %c0_3 = arith.constant 0 : index
    %c0_4 = arith.constant 0 : index
    %c0_5 = arith.constant 0 : index
    %c0_6 = arith.constant 0 : index
    %c0_7 = arith.constant 0 : index
    %10 = vector.load %arg6[%c0_3, %c0_4, %c0_5, %c0_6, %c0_7] : memref<1x1x16x16x8xf32, #tpu.memory_space<vmem>>, vector<1x1x16x16x8xf32>
    %11 = vector.shape_cast %10 : vector<1x1x16x16x8xf32> to vector<16x16x8xf32>
    %12 = vector.shape_cast %9 : vector<16x16x8xf32> to vector<1x1x16x16x8xf32>
    tpu.vector_store %arg6[%c0_3, %c0_4, %c0_5, %c0_6, %c0_7], %12 {strides = array<i32>} : memref<1x1x16x16x8xf32, #tpu.memory_space<vmem>>, vector<1x1x16x16x8xf32>,
    return
  }
  func.func @transform_0(%arg0: i32, %arg1: i32, %arg2: i32) -> (i32, i32, i32, i32, i32) {
    %c0_i32 = arith.constant 0 : i32
    %c0_i32_0 = arith.constant 0 : i32
    %c0_i32_1 = arith.constant 0 : i32
    %c0_i32_2 = arith.constant 0 : i32
    return %arg1, %arg0, %c0_i32, %c0_i32_0, %c0_i32_1 : i32, i32, i32, i32, i32
  }
  func.func @transform_1(%arg0: i32, %arg1: i32, %arg2: i32) -> (i32, i32, i32, i32) {
    %c0_i32 = arith.constant 0 : i32
    %c0_i32_0 = arith.constant 0 : i32
    %c0_i32_1 = arith.constant 0 : i32
    %c0_i32_2 = arith.constant 0 : i32
    return %arg0, %c0_i32, %c0_i32_0, %c0_i32_1 : i32, i32, i32, i32
  }
  func.func @transform_2(%arg0: i32, %arg1: i32, %arg2: i32) -> (i32, i32, i32) {
    %c0_i32 = arith.constant 0 : i32
    %c0_i32_0 = arith.constant 0 : i32
    %c0_i32_1 = arith.constant 0 : i32
    return %arg0, %c0_i32, %c0_i32_0 : i32, i32, i32
  }
  func.func @transform_3(%arg0: i32, %arg1: i32, %arg2: i32) -> (i32, i32, i32, i32, i32) {
    %c0_i32 = arith.constant 0 : i32
    %c0_i32_0 = arith.constant 0 : i32
    %c0_i32_1 = arith.constant 0 : i32
    return %arg1, %arg0, %arg2, %c0_i32, %c0_i32_0 : i32, i32, i32, i32, i32
  }
}

</mosaic_0001>

<bundles_post_ra>
// kernel: tpu_custom_call.1
= control target key start
LH: loop header
LB: loop body
LE: loop exit
PB: predicated region body
PF: predicated region fallthrough
CT: control target
= control target key end

     0   :  { %s3436_s12 = smov 0   ;;  %s3438_s13 = smov 0   ;;  %s4551_s0 = inlined_call_operand.vmem [shape: f32[2,1,22,22,8], index: 0, kind: input, shape index: {}]   ;;  %s4552_s1 = inlined_call_operand.vmem [shape: f32[1,49,8,8], index: 1, kind: input, shape index: {}]   ;;  %s4553_s2 = inlined_call_operand.vmem [shape: f32[1,1,8], index: 2, kind: input, shape index: {}]   ;;  %s4554_s3 = inlined_call_operand.vmem [shape: f32[2,1,16,16,8], index: 3, kind: output, shape index: {}]  }
   0x1   :  { %s3440_s14 = smov 0  }
   0x2 LB: > { %s28_s15 = sadd.s32 1, %s3278_s13  ;;  %p2591_p0 = scmp.ge.s32.totalorder %s3282_s14, 1  ;;  %s3282_s14 = sphi %s3440_s14, %s13_s14   ;;  %s3278_s13 = sphi %s3438_s13, %s4633_s13   ;;  %s3274_s12 = sphi %s3436_s12, %s4632_s12  }
   0x3   : > { %p30_p1 = scmp.ge.s32.totalorder %s28_s15, 2  ;;  %p184_p2 = scmp.lt.s32.totalorder %s3282_s14, 3 }
   0x5   : > { %s4635_s15 = smov (%p30_p1, %s28_s15), 0  ;;  %p185_p3 = pnand %p2591_p0, %p184_p2 }
   0x7   : > { %188 = sbr.rel (%p185_p3) target bundleno = 630 (0x276), region = 32 }
   0xc   : > { %p229_p4 = scmp.lt.s32.totalorder %s3274_s12, 1  ;;  %v3464_v0 = vmov 0.0   ;;  %v3466_v1 = vmov 0.0   ;;  %v3468_v2 = vmov 0.0   ;;  %v3470_v3 = vmov 0.0   ;;  %s3528_s24 = smov 0  }
   0xd   : > { %v3472_v4 = vmov 0.0   ;;  %v3474_v5 = vmov 0.0   ;;  %v3476_v6 = vmov 0.0   ;;  %v3478_v7 = vmov 0.0  }
   0xe   : > { %s4637_s12 = smov (!%p229_p4, %s3274_s12), 1  ;;  %v3480_v8 = vmov 0.0   ;;  %v3482_v9 = vmov 0.0   ;;  %v3484_v10 = vmov 0.0   ;;  %v3486_v11 = vmov 0.0  }
   0xf   : > { %s2838_s16 = smul.u32 528, %s4637_s12  ;;  %s2834_s17 = sshll.u32 %s4637_s12, 8  ;;  %v3488_v12 = vmov 0.0   ;;  %v3490_v13 = vmov 0.0   ;;  %v3492_v14 = vmov 0.0   ;;  %v3494_v15 = vmov 0.0  }
  0x10   : > { %s3457_s20 = scalar_lea.vmem %s4554_s3, %s2834_s17  ;;  %v3496_v16 = vmov 0.0   ;;  %v3498_v17 = vmov 0.0   ;;  %v3500_v18 = vmov 0.0   ;;  %v3502_v19 = vmov 0.0  }
  0x11   : > { %s3462_s23 = scalar_lea.vmem %s4551_s0, %s2838_s16  ;;  %v3504_v20 = vmov 0.0   ;;  %v3506_v21 = vmov 0.0   ;;  %v3508_v22 = vmov 0.0   ;;  %v3510_v23 = vmov 0.0  }
  0x12   : > { %v3512_v24 = vmov 0.0   ;;  %v3514_v25 = vmov 0.0   ;;  %v3516_v26 = vmov 0.0   ;;  %v3518_v27 = vmov 0.0  }
  0x13   : > { %v3520_v28 = vmov 0.0   ;;  %v3522_v29 = vmov 0.0   ;;  %v3524_v30 = vmov 0.0   ;;  %v3526_v31 = vmov 0.0  }
  0x14 LB: >> { %s301_s25 = smul.u32 24, %s3414_s24  ;;  %vm339_vm0 = vcmask 64512   ;;  %s267_s4 = sadd.s32 1, %s3414_s24   ;;  %s3414_s24 = sphi %s3528_s24, %s4624_s24   ;;  %v3410_v31 = vphi %v3526_v31, %v4623_v31   ;;  %v3406_v30 = vphi %v3524_v30, %v4622_v30   ;;  %v3402_v29 = vphi %v3522_v29, %v4621_v29   ;;  %v3398_v28 = vphi %v3520_v28, %v4620_v28   ;;  %v3394_v27 = vphi %v3518_v27, %v4619_v27   ;;  %v3390_v26 = vphi %v3516_v26, %v4618_v26   ;;  %v3386_v25 = vphi %v3514_v25, %v4617_v25   ;;  %v3382_v24 = vphi %v3512_v24, %v4616_v24   ;;  %v3378_v23 = vphi %v3510_v23, %v4615_v23   ;;  %v3374_v22 = vphi %v3508_v22, %v4614_v22   ;;  %v3370_v21 = vphi %v3506_v21, %v4613_v21   ;;  %v3366_v20 = vphi %v3504_v20, %v4612_v20   ;;  %v3362_v19 = vphi %v3502_v19, %v4611_v19   ;;  %v3358_v18 = vphi %v3500_v18, %v4610_v18   ;;  %v3354_v17 = vphi %v3498_v17, %v4609_v17   ;;  %v3350_v16 = vphi %v3496_v16, %v4608_v16   ;;  %v3346_v15 = vphi %v3494_v15, %v4607_v15   ;;  %v3342_v14 = vphi %v3492_v14, %v4606_v14   ;;  %v3338_v13 = vphi %v3490_v13, %v4605_v13   ;;  %v3334_v12 = vphi %v3488_v12, %v4604_v12   ;;  %v3330_v11 = vphi %v3486_v11, %v4603_v11   ;;  %v3326_v10 = vphi %v3484_v10, %v4602_v10   ;;  %v3322_v9 = vphi %v3482_v9, %v4601_v9   ;;  %v3318_v8 = vphi %v3480_v8, %v4600_v8   ;;  %v3314_v7 = vphi %v3478_v7, %v4599_v7   ;;  %v3310_v6 = vphi %v3476_v6, %v4598_v6   ;;  %v3306_v5 = vphi %v3474_v5, %v4597_v5   ;;  %v3302_v4 = vphi %v3472_v4, %v4596_v4   ;;  %v3298_v3 = vphi %v3470_v3, %v4595_v3   ;;  %v3294_v2 = vphi %v3468_v2, %v4594_v2   ;;  %v3290_v1 = vphi %v3466_v1, %v4592_v1   ;;  %v3286_v0 = vphi %v3464_v0, %v4590_v0  }
  0x15   : >> { %s2595_s26 = smul.u32 56, %s3414_s24  ;;  %p4337_p5 = scmp.ge.s32.totalorder %s267_s4, 7  }
  0x16   : >> { %s3632_s27 = scalar_lea.vmem %s3462_s23, %s301_s25  ;;  %s4624_s24 = smov %s267_s4 }
  0x17   : >> { %s3637_s30 = scalar_lea.vmem %s4552_s1, %s2595_s26  ;;  %v327_v32 = vld [vmem:[%s3632_s27 + $0x120] sm:$0xff]  ;;  %v328_v42 = vld [vmem:[%s3632_s27 + $0x128] sm:$0xff]  ;;  %v329_v46 = vld [vmem:[%s3632_s27 + $0x138] sm:$0xff] }
  0x18   : >> { %v858_v33 = vld [vmem:[%s3632_s27 + $0x2] sm:$0xff]  ;;  %v2663_v35 = vld [vmem:[%s3637_s30 + $0x10] sm:$0xff]  ;;  %v860_v47 = vld [vmem:[%s3632_s27 + $0x1a] sm:$0xff] }
  0x19   : >> { %v338_v34 = vld [vmem:[%s3637_s30] sm:$0xff]  ;;  %v2629_v36 = vld [vmem:[%s3637_s30 + $0x8] sm:$0xff]  ;;  %1005 = vmatpush.msra.mxu2 %v2663_v35  ;;  %v2799_v37 = vld [vmem:[%s3637_s30 + $0x30] sm:$0xff] }
  0x1a   : >> { %2835 = vmatpush.msra.mxu3 %v338_v34  ;;  %2664 = vmatmul.msk.f32.vlgmr.msra.gmra.mxu2 %vm339_vm0, %v858_v33  ;;  %v303_v38 = vld [vmem:[%s3632_s27] sm:$0xff]  ;;  %v2765_v41 = vld [vmem:[%s3637_s30 + $0x28] sm:$0xff]  ;;  %v305_v48 = vld [vmem:[%s3632_s27 + $0x18] sm:$0xff] }
  0x1b   : >> { %2620 = vmatmul.msk.f32.vlgmr.msra.gmra.mxu3 %vm339_vm0, %v327_v32  ;;  %v581_v39 = vld [vmem:[%s3632_s27 + $0x1] sm:$0xff]  ;;  %2113 = vmatpush.msrb.mxu2 %v2799_v37  ;;  %v859_v43 = vld [vmem:[%s3632_s27 + $0xa] sm:$0xff]  ;;  %v583_v49 = vld [vmem:[%s3632_s27 + $0x19] sm:$0xff] }
  0x1c   : >> { %2836 = vmatpush.msrb.mxu3 %v2629_v36  ;;  %v2731_v40 = vld [vmem:[%s3637_s30 + $0x20] sm:$0xff]  ;;  %451 = vmatpush.msra.mxu0 %v338_v34  ;;  %v304_v44 = vld [vmem:[%s3632_s27 + $0x8] sm:$0xff]  ;;  %v331_v54 = vld [vmem:[%s3632_s27 + $0x150] sm:$0xff] }
  0x1d   : >> { %728 = vmatpush.msra.mxu1 %v2629_v36  ;;  %2596 = vmatmul.msk.f32.vlgmr.msra.gmra.mxu0 %vm339_vm0, %v303_v38  ;;  %v582_v45 = vld [vmem:[%s3632_s27 + $0x9] sm:$0xff]  ;;  %v330_v50 = vld [vmem:[%s3632_s27 + $0x140] sm:$0xff]  ;;  %v862_v55 = vld [vmem:[%s3632_s27 + $0x32] sm:$0xff] }
  0x1e   : >> { %2630 = vmatmul.msk.f32.vlgmr.msra.gmra.mxu1 %vm339_vm0, %v581_v39  ;;  %1559 = vmatpush.msrb.mxu0 %v2731_v40  ;;  %v861_v51 = vld [vmem:[%s3632_s27 + $0x22] sm:$0xff]  ;;  %v307_v56 = vld [vmem:[%s3632_s27 + $0x30] sm:$0xff]  ;;  %v332_v58 = vld [vmem:[%s3632_s27 + $0x158] sm:$0xff] }
  0x1f   : >> { %1836 = vmatpush.msrb.mxu1 %v2765_v41  ;;  %2837 = vmatpush.msra.mxu3 %v2663_v35  ;;  %v306_v52 = vld [vmem:[%s3632_s27 + $0x20] sm:$0xff]  ;;  %v585_v57 = vld [vmem:[%s3632_s27 + $0x31] sm:$0xff]  ;;  %v333_v62 = vld [vmem:[%s3632_s27 + $0x168] sm:$0xff] }
  0x20   : >> { %v584_v53 = vld [vmem:[%s3632_s27 + $0x21] sm:$0xff]  ;;  %v308_v60 = vld [vmem:[%s3632_s27 + $0x38] sm:$0xff]  ;;  %v864_v63 = vld [vmem:[%s3632_s27 + $0x4a] sm:$0xff] }
  0x21   : >> { %v863_v59 = vld [vmem:[%s3632_s27 + $0x3a] sm:$0xff]  ;;  %v309_v32 = vld [vmem:[%s3632_s27 + $0x48] sm:$0xff]  ;;  %v334_v34 = vld [vmem:[%s3632_s27 + $0x170] sm:$0xff] }
  0x22   : >> { %2665 = vmatmul.msk.f32.gmra.mxu2 %vm339_vm0, %v859_v43  ;;  %v586_v61 = vld [vmem:[%s3632_s27 + $0x39] sm:$0xff]  ;;  %v587_v33 = vld [vmem:[%s3632_s27 + $0x49] sm:$0xff]  ;;  %v588_v37 = vld [vmem:[%s3632_s27 + $0x51] sm:$0xff] }
  0x23   : >> { %2621 = vmatmul.msk.f32.gmra.mxu3 %vm339_vm0, %v328_v42  ;;  %v865_v35 = vld [vmem:[%s3632_s27 + $0x52] sm:$0xff]  ;;  %v605_v38 = vld [vmem:[%s3632_s27 + $0x121] sm:$0xff]  ;;  %v606_v42 = vld [vmem:[%s3632_s27 + $0x129] sm:$0xff] }
  0x24   : >> { %v310_v36 = vld [vmem:[%s3632_s27 + $0x50] sm:$0xff]  ;;  %v866_v39 = vld [vmem:[%s3632_s27 + $0x62] sm:$0xff] }
  0x25   : >> { %2597 = vmatmul.msk.f32.gmra.mxu0 %vm339_vm0, %v304_v44  ;;  %v311_v40 = vld [vmem:[%s3632_s27 + $0x60] sm:$0xff]  ;;  %v867_v43 = vld [vmem:[%s3632_s27 + $0x6a] sm:$0xff] }
  0x26   : >> { %2631 = vmatmul.msk.f32.gmra.mxu1 %vm339_vm0, %v582_v45  ;;  %v589_v41 = vld [vmem:[%s3632_s27 + $0x61] sm:$0xff]  ;;  %v590_v45 = vld [vmem:[%s3632_s27 + $0x69] sm:$0xff] }
  0x27   : >> { %v312_v44 = vld [vmem:[%s3632_s27 + $0x68] sm:$0xff] }
  0x2a   : >> { %2666 = vmatmul.msk.f32.gmra.mxu2 %vm339_vm0, %v860_v47  ;;  %v868_v47 = vld [vmem:[%s3632_s27 + $0x7a] sm:$0xff] }
  0x2b   : >> { %2622 = vmatmul.msk.f32.gmra.mxu3 %vm339_vm0, %v329_v46  ;;  %v607_v46 = vld [vmem:[%s3632_s27 + $0x139] sm:$0xff] }
  0x2d   : >> { %2598 = vmatmul.msk.f32.gmra.mxu0 %vm339_vm0, %v305_v48  ;;  %v313_v48 = vld [vmem:[%s3632_s27 + $0x78] sm:$0xff] }
  0x2e   : >> { %2632 = vmatmul.msk.f32.gmra.mxu1 %vm339_vm0, %v583_v49  ;;  %v591_v49 = vld [vmem:[%s3632_s27 + $0x79] sm:$0xff] }
  0x32   : >> { %2667 = vmatmul.msk.f32.gmra.mxu2 %vm339_vm0, %v861_v51  ;;  %v869_v51 = vld [vmem:[%s3632_s27 + $0x82] sm:$0xff] }
  0x33   : >> { %2623 = vmatmul.msk.f32.gmra.mxu3 %vm339_vm0, %v330_v50  ;;  %v608_v50 = vld [vmem:[%s3632_s27 + $0x141] sm:$0xff] }
  0x35   : >> { %2599 = vmatmul.msk.f32.gmra.mxu0 %vm339_vm0, %v306_v52  ;;  %v314_v52 = vld [vmem:[%s3632_s27 + $0x80] sm:$0xff] }
  0x36   : >> { %2633 = vmatmul.msk.f32.gmra.mxu1 %vm339_vm0, %v584_v53  ;;  %v592_v53 = vld [vmem:[%s3632_s27 + $0x81] sm:$0xff] }
  0x3a   : >> { %2668 = vmatmul.msk.f32.gmra.mxu2 %vm339_vm0, %v862_v55  ;;  %v870_v55 = vld [vmem:[%s3632_s27 + $0x92] sm:$0xff] }
  0x3b   : >> { %2624 = vmatmul.msk.f32.gmra.mxu3 %vm339_vm0, %v331_v54  ;;  %v609_v54 = vld [vmem:[%s3632_s27 + $0x151] sm:$0xff] }
  0x3d   : >> { %2600 = vmatmul.msk.f32.gmra.mxu0 %vm339_vm0, %v307_v56  ;;  %v315_v56 = vld [vmem:[%s3632_s27 + $0x90] sm:$0xff] }
  0x3e   : >> { %2634 = vmatmul.msk.f32.gmra.mxu1 %vm339_vm0, %v585_v57  ;;  %v593_v57 = vld [vmem:[%s3632_s27 + $0x91] sm:$0xff] }
  0x42   : >> { %2669 = vmatmul.msk.f32.gmra.mxu2 %vm339_vm0, %v863_v59  ;;  %v610_v59 = vld [vmem:[%s3632_s27 + $0x159] sm:$0xff] }
  0x43   : >> { %2625 = vmatmul.msk.f32.gmra.mxu3 %vm339_vm0, %v332_v58  ;;  %v2697_v58 = vld [vmem:[%s3637_s30 + $0x18] sm:$0xff] }
  0x45   : >> { %2601 = vmatmul.msk.f32.gmra.mxu0 %vm339_vm0, %v308_v60  ;;  %v871_v60 = vld [vmem:[%s3632_s27 + $0x9a] sm:$0xff] }
  0x46   : >> { %2635 = vmatmul.msk.f32.gmra.mxu1 %vm339_vm0, %v586_v61  ;;  %v316_v61 = vld [vmem:[%s3632_s27 + $0x98] sm:$0xff] }
  0x4a   : >> { %2670 = vmatmul.msk.f32.gmra.mxu2 %vm339_vm0, %v864_v63  ;;  %v611_v63 = vld [vmem:[%s3632_s27 + $0x169] sm:$0xff] }
  0x4b   : >> { %2626 = vmatmul.msk.f32.gmra.mxu3 %vm339_vm0, %v333_v62  ;;  %v594_v62 = vld [vmem:[%s3632_s27 + $0x99] sm:$0xff] }
  0x4d   : >> { %2602 = vmatmul.msk.f32.gmra.mxu0 %vm339_vm0, %v309_v32  ;;  %v872_v32 = vld [vmem:[%s3632_s27 + $0xaa] sm:$0xff] }
  0x4e   : >> { %2636 = vmatmul.msk.f32.gmra.mxu1 %vm339_vm0, %v587_v33  ;;  %v317_v33 = vld [vmem:[%s3632_s27 + $0xa8] sm:$0xff] }
  0x52   : >> { %2671 = vmatmul.msk.f32.gmra.mxu2 %vm339_vm0, %v865_v35  ;;  %v612_v35 = vld [vmem:[%s3632_s27 + $0x171] sm:$0xff] }
  0x53   : >> { %2627 = vmatmul.msk.f32.gmra.mxu3 %vm339_vm0, %v334_v34  ;;  %v595_v34 = vld [vmem:[%s3632_s27 + $0xa9] sm:$0xff] }
  0x55   : >> { %2603 = vmatmul.msk.f32.gmra.mxu0 %vm339_vm0, %v310_v36  ;;  %v873_v36 = vld [vmem:[%s3632_s27 + $0xb2] sm:$0xff] }
  0x56   : >> { %2637 = vmatmul.msk.f32.gmra.mxu1 %vm339_vm0, %v588_v37  ;;  %v318_v37 = vld [vmem:[%s3632_s27 + $0xb0] sm:$0xff] }
  0x5a   : >> { %2672 = vmatmul.msk.f32.gmra.mxu2 %vm339_vm0, %v866_v39  ;;  %v882_v39 = vld [vmem:[%s3632_s27 + $0x122] sm:$0xff] }
  0x5b   : >> { %2654 = vmatmul.msk.f32.vlgmr.msrb.gmra.mxu3 %vm339_vm0, %v605_v38  ;;  %v596_v38 = vld [vmem:[%s3632_s27 + $0xb1] sm:$0xff] }
  0x5c   : >> { %1282 = vmatpush.msrb.mxu3 %v2697_v58 }
  0x5d   : >> { %2604 = vmatmul.msk.f32.gmra.mxu0 %vm339_vm0, %v311_v40  ;;  %v874_v40 = vld [vmem:[%s3632_s27 + $0xc2] sm:$0xff] }
  0x5e   : >> { %2638 = vmatmul.msk.f32.gmra.mxu1 %vm339_vm0, %v589_v41 }
  0x62   : >> { %2673 = vmatmul.msk.f32.gmra.mxu2 %vm339_vm0, %v867_v43  ;;  %v319_v43 = vld [vmem:[%s3632_s27 + $0xc0] sm:$0xff] }
  0x63   : >> { %2655 = vmatmul.msk.f32.gmra.mxu3 %vm339_vm0, %v606_v42 }
  0x65   : >> { %2605 = vmatmul.msk.f32.gmra.mxu0 %vm339_vm0, %v312_v44  ;;  %v597_v44 = vld [vmem:[%s3632_s27 + $0xc1] sm:$0xff] }
  0x66   : >> { %2639 = vmatmul.msk.f32.gmra.mxu1 %vm339_vm0, %v590_v45 }
  0x6a   : >> { %2674 = vmatmul.msk.f32.gmra.mxu2 %vm339_vm0, %v868_v47 }
  0x6b   : >> { %2656 = vmatmul.msk.f32.gmra.mxu3 %vm339_vm0, %v607_v46 }
  0x6d   : >> { %2606 = vmatmul.msk.f32.gmra.mxu0 %vm339_vm0, %v313_v48 }
  0x6e   : >> { %2640 = vmatmul.msk.f32.gmra.mxu1 %vm339_vm0, %v591_v49  ;;  %v883_v49 = vld [vmem:[%s3632_s27 + $0x12a] sm:$0xff] }
  0x72   : >> { %2675 = vmatmul.msk.f32.gmra.mxu2 %vm339_vm0, %v869_v51  ;;  %v875_v51 = vld [vmem:[%s3632_s27 + $0xca] sm:$0xff] }
  0x73   : >> { %2657 = vmatmul.msk.f32.gmra.mxu3 %vm339_vm0, %v608_v50 }
  0x75   : >> { %2607 = vmatmul.msk.f32.gmra.mxu0 %vm339_vm0, %v314_v52 }
  0x76   : >> { %2641 = vmatmul.msk.f32.gmra.mxu1 %vm339_vm0, %v592_v53  ;;  %v320_v53 = vld [vmem:[%s3632_s27 + $0xc8] sm:$0xff] }
  0x7a   : >> { %2676 = vmatmul.msk.f32.gmra.mxu2 %vm339_vm0, %v870_v55 }
  0x7b   : >> { %2658 = vmatmul.msk.f32.gmra.mxu3 %vm339_vm0, %v609_v54  ;;  %v598_v54 = vld [vmem:[%s3632_s27 + $0xc9] sm:$0xff] }
  0x7d   : >> { %2608 = vmatmul.msk.f32.gmra.mxu0 %vm339_vm0, %v315_v56 }
  0x7e   : >> { %2642 = vmatmul.msk.f32.gmra.mxu1 %vm339_vm0, %v593_v57 }
  0x82   : >> { %2677 = vmatmul.msk.f32.gmra.mxu2 %vm339_vm0, %v871_v60 }
  0x83   : >> { %2659 = vmatmul.msk.f32.gmra.mxu3 %vm339_vm0, %v610_v59  ;;  %v884_v59 = vld [vmem:[%s3632_s27 + $0x13a] sm:$0xff] }
  0x85   : >> { %2609 = vmatmul.msk.f32.gmra.mxu0 %vm339_vm0, %v316_v61  ;;  %v876_v61 = vld [vmem:[%s3632_s27 + $0xda] sm:$0xff] }
  0x86   : >> { %2643 = vmatmul.msk.f32.gmra.mxu1 %vm339_vm0, %v594_v62 }
  0x8a   : >> { %2678 = vmatmul.msk.f32.gmra.mxu2 %vm339_vm0, %v872_v32  ;;  %v599_v32 = vld [vmem:[%s3632_s27 + $0xd9] sm:$0xff] }
  0x8b   : >> { %2660 = vmatmul.msk.f32.gmra.mxu3 %vm339_vm0, %v611_v63  ;;  %v321_v63 = vld [vmem:[%s3632_s27 + $0xd8] sm:$0xff] }
  0x8d   : >> { %2610 = vmatmul.msk.f32.gmra.mxu0 %vm339_vm0, %v317_v33 }
  0x8e   : >> { %2644 = vmatmul.msk.f32.gmra.mxu1 %vm339_vm0, %v595_v34 }
  0x92   : >> { %2679 = vmatmul.msk.f32.gmra.mxu2 %vm339_vm0, %v873_v36 }
  0x93   : >> { %2661 = vmatmul.msk.f32.gmra.mxu3 %vm339_vm0, %v612_v35 }
  0x95   : >> { %2611 = vmatmul.msk.f32.gmra.mxu0 %vm339_vm0, %v318_v37  ;;  %v885_v37 = vld [vmem:[%s3632_s27 + $0x142] sm:$0xff] }
  0x96   : >> { %2645 = vmatmul.msk.f32.gmra.mxu1 %vm339_vm0, %v596_v38 }
  0x9a   : >> { %v453_v41 = vpop.f32.mrf.mxu0  ;;  %2680 = vmatmul.msk.f32.gmra.mxu2 %vm339_vm0, %v874_v40 }
  0x9b   : >> { %2688 = vmatmul.msk.f32.vlgmr.msra.gmra.mxu3 %vm339_vm0, %v882_v39  ;;  %v730_v42 = vpop.f32.mrf.mxu1  ;;  %v549_v45 = vadd.f32 %v3410_v31, %v453_v41  ;;  %v877_v39 = vld [vmem:[%s3632_s27 + $0xe2] sm:$0xff] }
  0x9c   : >> { %v322_v41 = vld [vmem:[%s3632_s27 + $0xe0] sm:$0xff] }
  0x9d   : >> { %v826_v47 = vadd.f32 %v730_v42, %v549_v45  ;;  %2612 = vmatmul.msk.f32.gmra.mxu0 %vm339_vm0, %v319_v43  ;;  %v1007_v48 = vpop.f32.mrf.mxu2  ;;  %v600_v42 = vld [vmem:[%s3632_s27 + $0xe1] sm:$0xff] }
  0x9e   : >> { %v3781_v46 = vpop.f32.mrf.mxu3  ;;  %2646 = vmatmul.msk.f32.gmra.mxu1 %vm339_vm0, %v597_v44 }
  0x9f   : >> { %v3786_v50 = vadd.f32 %v1007_v48, %v826_v47  ;;  %v886_v48 = vld [vmem:[%s3632_s27 + $0x152] sm:$0xff] }
  0xa2   : >> { %v456_v52 = vpop.f32.mrf.mxu0  ;;  %2681 = vmatmul.msk.f32.gmra.mxu2 %vm339_vm0, %v875_v51  ;;  %v878_v51 = vld [vmem:[%s3632_s27 + $0xf2] sm:$0xff] }
  0xa3   : >> { %2689 = vmatmul.msk.f32.gmra.mxu3 %vm339_vm0, %v883_v49  ;;  %v733_v31 = vpop.f32.mrf.mxu1  ;;  %v550_v55 = vadd.f32 %v3406_v30, %v456_v52 }
  0xa5   : >> { %v827_v57 = vadd.f32 %v733_v31, %v550_v55  ;;  %2613 = vmatmul.msk.f32.gmra.mxu0 %vm339_vm0, %v320_v53  ;;  %v1010_v58 = vpop.f32.mrf.mxu2  ;;  %v323_v31 = vld [vmem:[%s3632_s27 + $0xf0] sm:$0xff] }
  0xa6   : >> { %v3794_v56 = vpop.f32.mrf.mxu3  ;;  %2647 = vmatmul.msk.f32.gmra.mxu1 %vm339_vm0, %v598_v54  ;;  %v601_v53 = vld [vmem:[%s3632_s27 + $0xf1] sm:$0xff] }
  0xa7   : >> { %v3799_v60 = vadd.f32 %v1010_v58, %v827_v57 }
  0xaa   : >> { %v459_v62 = vpop.f32.mrf.mxu0  ;;  %2682 = vmatmul.msk.f32.gmra.mxu2 %vm339_vm0, %v876_v61 }
  0xab   : >> { %2690 = vmatmul.msk.f32.gmra.mxu3 %vm339_vm0, %v884_v59  ;;  %v736_v30 = vpop.f32.mrf.mxu1  ;;  %v551_v33 = vadd.f32 %v3402_v29, %v459_v62  ;;  %v887_v59 = vld [vmem:[%s3632_s27 + $0x15a] sm:$0xff] }
  0xac   : >> { %v879_v62 = vld [vmem:[%s3632_s27 + $0xfa] sm:$0xff] }
  0xad   : >> { %v828_v35 = vadd.f32 %v736_v30, %v551_v33  ;;  %2614 = vmatmul.msk.f32.gmra.mxu0 %vm339_vm0, %v321_v63  ;;  %v1013_v36 = vpop.f32.mrf.mxu2  ;;  %v324_v63 = vld [vmem:[%s3632_s27 + $0xf8] sm:$0xff] }
  0xae   : >> { %v3807_v34 = vpop.f32.mrf.mxu3  ;;  %2648 = vmatmul.msk.f32.gmra.mxu1 %vm339_vm0, %v599_v32  ;;  %v602_v32 = vld [vmem:[%s3632_s27 + $0xf9] sm:$0xff] }
  0xaf   : >> { %v3812_v38 = vadd.f32 %v1013_v36, %v828_v35 }
  0xb2   : >> { %v462_v40 = vpop.f32.mrf.mxu0  ;;  %2683 = vmatmul.msk.f32.gmra.mxu2 %vm339_vm0, %v877_v39  ;;  %v888_v39 = vld [vmem:[%s3632_s27 + $0x16a] sm:$0xff] }
  0xb3   : >> { %2691 = vmatmul.msk.f32.gmra.mxu3 %vm339_vm0, %v885_v37  ;;  %v739_v29 = vpop.f32.mrf.mxu1  ;;  %v552_v43 = vadd.f32 %v3398_v28, %v462_v40 }
  0xb5   : >> { %v829_v45 = vadd.f32 %v739_v29, %v552_v43  ;;  %2615 = vmatmul.msk.f32.gmra.mxu0 %vm339_vm0, %v322_v41  ;;  %v1016_v47 = vpop.f32.mrf.mxu2  ;;  %v880_v29 = vld [vmem:[%s3632_s27 + $0x10a] sm:$0xff] }
  0xb6   : >> { %v3820_v44 = vpop.f32.mrf.mxu3  ;;  %2649 = vmatmul.msk.f32.gmra.mxu1 %vm339_vm0, %v600_v42  ;;  %v325_v42 = vld [vmem:[%s3632_s27 + $0x108] sm:$0xff] }
  0xb7   : >> { %v3825_v49 = vadd.f32 %v1016_v47, %v829_v45  ;;  %v603_v43 = vld [vmem:[%s3632_s27 + $0x109] sm:$0xff] }
  0xba   : >> { %v465_v52 = vpop.f32.mrf.mxu0  ;;  %2684 = vmatmul.msk.f32.gmra.mxu2 %vm339_vm0, %v878_v51 }
  0xbb   : >> { %2692 = vmatmul.msk.f32.gmra.mxu3 %vm339_vm0, %v886_v48  ;;  %v742_v28 = vpop.f32.mrf.mxu1  ;;  %v553_v54 = vadd.f32 %v3394_v27, %v465_v52  ;;  %v889_v52 = vld [vmem:[%s3632_s27 + $0x172] sm:$0xff] }
  0xbd   : >> { %v830_v57 = vadd.f32 %v742_v28, %v553_v54  ;;  %2616 = vmatmul.msk.f32.gmra.mxu0 %vm339_vm0, %v323_v31  ;;  %v1019_v58 = vpop.f32.mrf.mxu2  ;;  %v881_v31 = vld [vmem:[%s3632_s27 + $0x112] sm:$0xff] }
  0xbe   : >> { %v3833_v55 = vpop.f32.mrf.mxu3  ;;  %2650 = vmatmul.msk.f32.gmra.mxu1 %vm339_vm0, %v601_v53  ;;  %v326_v54 = vld [vmem:[%s3632_s27 + $0x110] sm:$0xff] }
  0xbf   : >> { %v3838_v61 = vadd.f32 %v1019_v58, %v830_v57  ;;  %v604_v57 = vld [vmem:[%s3632_s27 + $0x111] sm:$0xff] }
  0xc2   : >> { %v468_v30 = vpop.f32.mrf.mxu0  ;;  %2685 = vmatmul.msk.f32.gmra.mxu2 %vm339_vm0, %v879_v62 }
  0xc3   : >> { %2693 = vmatmul.msk.f32.gmra.mxu3 %vm339_vm0, %v887_v59  ;;  %v745_v27 = vpop.f32.mrf.mxu1  ;;  %v554_v33 = vadd.f32 %v3390_v26, %v468_v30 }
  0xc5   : >> { %v831_v36 = vadd.f32 %v745_v27, %v554_v33  ;;  %2617 = vmatmul.msk.f32.gmra.mxu0 %vm339_vm0, %v324_v63  ;;  %v1022_v37 = vpop.f32.mrf.mxu2  ;;  %v1135_v27 = vld [vmem:[%s3632_s27 + $0x3] sm:$0xff] }
  0xc6   : >> { %v3846_v35 = vpop.f32.mrf.mxu3  ;;  %2651 = vmatmul.msk.f32.gmra.mxu1 %vm339_vm0, %v602_v32  ;;  %v1966_v32 = vld [vmem:[%s3632_s27 + $0x6] sm:$0xff] }
  0xc7   : >> { %v3851_v40 = vadd.f32 %v1022_v37, %v831_v36  ;;  %v1412_v36 = vld [vmem:[%s3632_s27 + $0x4] sm:$0xff] }
  0xc8   : >> { %v1689_v37 = vld [vmem:[%s3632_s27 + $0x5] sm:$0xff] }
  0xca   : >> { %v471_v41 = vpop.f32.mrf.mxu0  ;;  %2686 = vmatmul.msk.f32.gmra.mxu2 %vm339_vm0, %v880_v29  ;;  %v573_v29 = vadd.f32 %v3314_v7, %v3781_v46  ;;  %v1413_v46 = vld [vmem:[%s3632_s27 + $0xc] sm:$0xff] }
  0xcb   : >> { %2694 = vmatmul.msk.f32.gmra.mxu3 %vm339_vm0, %v888_v39  ;;  %v748_v26 = vpop.f32.mrf.mxu1  ;;  %v555_v45 = vadd.f32 %v3386_v25, %v471_v41 }
  0xcd   : >> { %v832_v48 = vadd.f32 %v748_v26, %v555_v45  ;;  %2618 = vmatmul.msk.f32.gmra.mxu0 %vm339_vm0, %v325_v42  ;;  %v1025_v51 = vpop.f32.mrf.mxu2  ;;  %v1136_v45 = vld [vmem:[%s3632_s27 + $0xb] sm:$0xff] }
  0xce   : >> { %v3859_v47 = vpop.f32.mrf.mxu3  ;;  %2652 = vmatmul.msk.f32.gmra.mxu1 %vm339_vm0, %v603_v43 }
  0xcf   : >> { %v3864_v28 = vadd.f32 %v1025_v51, %v832_v48  ;;  %v1967_v51 = vld [vmem:[%s3632_s27 + $0xe] sm:$0xff] }
  0xd2   : >> { %v474_v53 = vpop.f32.mrf.mxu0  ;;  %2687 = vmatmul.msk.f32.gmra.mxu2 %vm339_vm0, %v881_v31 }
  0xd3   : >> { %2695 = vmatmul.msk.f32.gmra.mxu3 %vm339_vm0, %v889_v52  ;;  %v751_v25 = vpop.f32.mrf.mxu1  ;;  %v556_v58 = vadd.f32 %v3382_v24, %v474_v53  ;;  %v1690_v52 = vld [vmem:[%s3632_s27 + $0xd] sm:$0xff]  ;;  %v574_v53 = vadd.f32 %v3310_v6, %v3794_v56  ;;  %v1414_v56 = vld [vmem:[%s3632_s27 + $0x1c] sm:$0xff] }
  0xd5   : >> { %v833_v62 = vadd.f32 %v751_v25, %v556_v58  ;;  %2619 = vmatmul.msk.f32.gmra.mxu0 %vm339_vm0, %v326_v54  ;;  %v1028_v30 = vpop.f32.mrf.mxu2 }
  0xd6   : >> { %v3872_v59 = vpop.f32.mrf.mxu3  ;;  %2653 = vmatmul.msk.f32.gmra.mxu1 %vm339_vm0, %v604_v57 }
  0xd7   : >> { %v3877_v63 = vadd.f32 %v1028_v30, %v833_v62  ;;  %v1137_v62 = vld [vmem:[%s3632_s27 + $0x1b] sm:$0xff] }
  0xda   : >> { %v477_v33 = vpop.f32.mrf.mxu0  ;;  %2800 = vmatmul.msk.f32.vlgmr.msrb.gmra.mxu2 %vm339_vm0, %v1966_v32  ;;  %v1691_v32 = vld [vmem:[%s3632_s27 + $0x1d] sm:$0xff] }
  0xdb   : >> { %2698 = vmatmul.msk.f32.vlgmr.msrb.gmra.mxu3 %vm339_vm0, %v1135_v27  ;;  %v754_v24 = vpop.f32.mrf.mxu1  ;;  %v557_v39 = vadd.f32 %v3378_v23, %v477_v33  ;;  %v1968_v27 = vld [vmem:[%s3632_s27 + $0x1e] sm:$0xff] }
  0xdd   : >> { %v834_v26 = vadd.f32 %v754_v24, %v557_v39  ;;  %2732 = vmatmul.msk.f32.vlgmr.msrb.gmra.mxu0 %vm339_vm0, %v1412_v36  ;;  %v1031_v42 = vpop.f32.mrf.mxu2  ;;  %v575_v24 = vadd.f32 %v3306_v5, %v3807_v34  ;;  %v1415_v34 = vld [vmem:[%s3632_s27 + $0x24] sm:$0xff] }
  0xde   : >> { %v802_v41 = vpop.f32.mrf.mxu3  ;;  %2766 = vmatmul.msk.f32.vlgmr.msrb.gmra.mxu1 %vm339_vm0, %v1689_v37 }
  0xdf   : >> { %v3889_v43 = vadd.f32 %v802_v41, %v573_v29  ;;  %v3892_v48 = vadd.f32 %v1031_v42, %v834_v26  ;;  %v1138_v41 = vld [vmem:[%s3632_s27 + $0x23] sm:$0xff] }
  0xe0   : >> { %v1969_v42 = vld [vmem:[%s3632_s27 + $0x26] sm:$0xff] }
  0xe2   : >> { %v480_v23 = vpop.f32.mrf.mxu0  ;;  %2801 = vmatmul.msk.f32.gmra.mxu2 %vm339_vm0, %v1967_v51 }
  0xe3   : >> { %2699 = vmatmul.msk.f32.gmra.mxu3 %vm339_vm0, %v1136_v45  ;;  %v757_v7 = vpop.f32.mrf.mxu1  ;;  %v558_v31 = vadd.f32 %v3374_v22, %v480_v23  ;;  %v1692_v45 = vld [vmem:[%s3632_s27 + $0x25] sm:$0xff]  ;;  %v576_v23 = vadd.f32 %v3302_v4, %v3820_v44  ;;  %v1416_v44 = vld [vmem:[%s3632_s27 + $0x34] sm:$0xff] }
  0xe5   : >> { %v835_v54 = vadd.f32 %v757_v7, %v558_v31  ;;  %2733 = vmatmul.msk.f32.gmra.mxu0 %vm339_vm0, %v1413_v46  ;;  %v1034_v57 = vpop.f32.mrf.mxu2 }
  0xe6   : >> { %v805_v25 = vpop.f32.mrf.mxu3  ;;  %2767 = vmatmul.msk.f32.gmra.mxu1 %vm339_vm0, %v1690_v52 }
  0xe7   : >> { %v3904_v58 = vadd.f32 %v805_v25, %v574_v53  ;;  %v3907_v30 = vadd.f32 %v1034_v57, %v835_v54  ;;  %v1139_v53 = vld [vmem:[%s3632_s27 + $0x33] sm:$0xff] }
  0xe8   : >> { %v1970_v54 = vld [vmem:[%s3632_s27 + $0x36] sm:$0xff] }
  0xe9   : >> { %v1693_v57 = vld [vmem:[%s3632_s27 + $0x35] sm:$0xff] }
  0xea   : >> { %v483_v22 = vpop.f32.mrf.mxu0  ;;  %2802 = vmatmul.msk.f32.gmra.mxu2 %vm339_vm0, %v1968_v27  ;;  %v577_v27 = vadd.f32 %v3298_v3, %v3833_v55  ;;  %v1417_v55 = vld [vmem:[%s3632_s27 + $0x3c] sm:$0xff] }
  0xeb   : >> { %2700 = vmatmul.msk.f32.gmra.mxu3 %vm339_vm0, %v1137_v62  ;;  %v760_v6 = vpop.f32.mrf.mxu1  ;;  %v559_v33 = vadd.f32 %v3370_v21, %v483_v22 }
  0xed   : >> { %v836_v37 = vadd.f32 %v760_v6, %v559_v33  ;;  %2734 = vmatmul.msk.f32.gmra.mxu0 %vm339_vm0, %v1414_v56  ;;  %v1037_v39 = vpop.f32.mrf.mxu2  ;;  %v1140_v33 = vld [vmem:[%s3632_s27 + $0x3b] sm:$0xff] }
  0xee   : >> { %v808_v36 = vpop.f32.mrf.mxu3  ;;  %2768 = vmatmul.msk.f32.gmra.mxu1 %vm339_vm0, %v1691_v32 }
  0xef   : >> { %v3919_v29 = vadd.f32 %v808_v36, %v575_v24  ;;  %v3922_v26 = vadd.f32 %v1037_v39, %v836_v37  ;;  %v1971_v36 = vld [vmem:[%s3632_s27 + $0x3e] sm:$0xff] }
  0xf0   : >> { %v1694_v37 = vld [vmem:[%s3632_s27 + $0x3d] sm:$0xff] }
  0xf2   : >> { %v486_v21 = vpop.f32.mrf.mxu0  ;;  %2803 = vmatmul.msk.f32.gmra.mxu2 %vm339_vm0, %v1969_v42 }
  0xf3   : >> { %2701 = vmatmul.msk.f32.gmra.mxu3 %vm339_vm0, %v1138_v41  ;;  %v763_v5 = vpop.f32.mrf.mxu1  ;;  %v560_v51 = vadd.f32 %v3366_v20, %v486_v21  ;;  %v578_v41 = vadd.f32 %v3294_v2, %v3846_v35  ;;  %v1418_v35 = vld [vmem:[%s3632_s27 + $0x4c] sm:$0xff] }
  0xf5   : >> { %v837_v46 = vadd.f32 %v763_v5, %v560_v51  ;;  %2735 = vmatmul.msk.f32.gmra.mxu0 %vm339_vm0, %v1415_v34  ;;  %v1040_v52 = vpop.f32.mrf.mxu2 }
  0xf6   : >> { %v811_v7 = vpop.f32.mrf.mxu3  ;;  %2769 = vmatmul.msk.f32.gmra.mxu1 %vm339_vm0, %v1692_v45  ;;  %v1141_v45 = vld [vmem:[%s3632_s27 + $0x4b] sm:$0xff] }
  0xf7   : >> { %v3934_v31 = vadd.f32 %v811_v7, %v576_v23  ;;  %v3937_v25 = vadd.f32 %v1040_v52, %v837_v46  ;;  %v1972_v23 = vld [vmem:[%s3632_s27 + $0x4e] sm:$0xff]  ;;  %v579_v52 = vadd.f32 %v3290_v1, %v3859_v47 }
  0xf8   : >> { %v1695_v7 = vld [vmem:[%s3632_s27 + $0x4d] sm:$0xff] }
  0xf9   : >> { %v1419_v47 = vld [vmem:[%s3632_s27 + $0x54] sm:$0xff] }
  0xfa   : >> { %v489_v20 = vpop.f32.mrf.mxu0  ;;  %2804 = vmatmul.msk.f32.gmra.mxu2 %vm339_vm0, %v1970_v54 }
  0xfb   : >> { %2702 = vmatmul.msk.f32.gmra.mxu3 %vm339_vm0, %v1139_v53  ;;  %v766_v4 = vpop.f32.mrf.mxu1  ;;  %v561_v62 = vadd.f32 %v3362_v19, %v489_v20 }
  0xfd   : >> { %v838_v6 = vadd.f32 %v766_v4, %v561_v62  ;;  %2736 = vmatmul.msk.f32.gmra.mxu0 %vm339_vm0, %v1416_v44  ;;  %v1043_v56 = vpop.f32.mrf.mxu2  ;;  %v1142_v44 = vld [vmem:[%s3632_s27 + $0x53] sm:$0xff] }
  0xfe   : >> { %v814_v22 = vpop.f32.mrf.mxu3  ;;  %2770 = vmatmul.msk.f32.gmra.mxu1 %vm339_vm0, %v1693_v57  ;;  %v1973_v62 = vld [vmem:[%s3632_s27 + $0x56] sm:$0xff] }
  0xff   : >> { %v3949_v32 = vadd.f32 %v814_v22, %v577_v27  ;;  %v3952_v24 = vadd.f32 %v1043_v56, %v838_v6  ;;  %v1696_v27 = vld [vmem:[%s3632_s27 + $0x55] sm:$0xff]  ;;  %v580_v6 = vadd.f32 %v3286_v0, %v3872_v59  ;;  %v1420_v59 = vld [vmem:[%s3632_s27 + $0x64] sm:$0xff] }
 0x102   : >> { %v492_v19 = vpop.f32.mrf.mxu0  ;;  %2805 = vmatmul.msk.f32.gmra.mxu2 %vm339_vm0, %v1971_v36 }
 0x103   : >> { %2703 = vmatmul.msk.f32.gmra.mxu3 %vm339_vm0, %v1140_v33  ;;  %v769_v3 = vpop.f32.mrf.mxu1  ;;  %v562_v39 = vadd.f32 %v3358_v18, %v492_v19 }
 0x105   : >> { %v839_v21 = vadd.f32 %v769_v3, %v562_v39  ;;  %2737 = vmatmul.msk.f32.gmra.mxu0 %vm339_vm0, %v1417_v55  ;;  %v1046_v5 = vpop.f32.mrf.mxu2  ;;  %v1143_v3 = vld [vmem:[%s3632_s27 + $0x63] sm:$0xff] }
 0x106   : >> { %v817_v42 = vpop.f32.mrf.mxu3  ;;  %2771 = vmatmul.msk.f32.gmra.mxu1 %vm339_vm0, %v1694_v37  ;;  %v1974_v37 = vld [vmem:[%s3632_s27 + $0x66] sm:$0xff] }
 0x107   : >> { %v3964_v34 = vadd.f32 %v817_v42, %v578_v41  ;;  %v3967_v51 = vadd.f32 %v1046_v5, %v839_v21  ;;  %v1697_v39 = vld [vmem:[%s3632_s27 + $0x65] sm:$0xff] }
 0x10a   : >> { %v495_v18 = vpop.f32.mrf.mxu0  ;;  %2806 = vmatmul.msk.f32.gmra.mxu2 %vm339_vm0, %v1972_v23  ;;  %v1144_v23 = vld [vmem:[%s3632_s27 + $0x6b] sm:$0xff] }
 0x10b   : >> { %2704 = vmatmul.msk.f32.gmra.mxu3 %vm339_vm0, %v1141_v45  ;;  %v772_v2 = vpop.f32.mrf.mxu1  ;;  %v563_v46 = vadd.f32 %v3354_v17, %v495_v18 }
 0x10d   : >> { %v840_v54 = vadd.f32 %v772_v2, %v563_v46  ;;  %2738 = vmatmul.msk.f32.gmra.mxu0 %vm339_vm0, %v1418_v35  ;;  %v1049_v20 = vpop.f32.mrf.mxu2  ;;  %v1975_v2 = vld [vmem:[%s3632_s27 + $0x6e] sm:$0xff] }
 0x10e   : >> { %v820_v53 = vpop.f32.mrf.mxu3  ;;  %2772 = vmatmul.msk.f32.gmra.mxu1 %vm339_vm0, %v1695_v7  ;;  %v1421_v7 = vld [vmem:[%s3632_s27 + $0x6c] sm:$0xff] }
 0x10f   : >> { %v3979_v4 = vadd.f32 %v820_v53, %v579_v52  ;;  %v3982_v57 = vadd.f32 %v1049_v20, %v840_v54  ;;  %v1698_v46 = vld [vmem:[%s3632_s27 + $0x6d] sm:$0xff] }
 0x112   : >> { %v498_v17 = vpop.f32.mrf.mxu0  ;;  %2807 = vmatmul.msk.f32.gmra.mxu2 %vm339_vm0, %v1973_v62 }
 0x113   : >> { %2705 = vmatmul.msk.f32.gmra.mxu3 %vm339_vm0, %v1142_v44  ;;  %v775_v1 = vpop.f32.mrf.mxu1  ;;  %v564_v22 = vadd.f32 %v3350_v16, %v498_v17  ;;  %v1145_v44 = vld [vmem:[%s3632_s27 + $0x7b] sm:$0xff] }
 0x114   : >> { %v1976_v17 = vld [vmem:[%s3632_s27 + $0x7e] sm:$0xff] }
 0x115   : >> { %v841_v33 = vadd.f32 %v775_v1, %v564_v22  ;;  %2739 = vmatmul.msk.f32.gmra.mxu0 %vm339_vm0, %v1419_v47  ;;  %v1052_v36 = vpop.f32.mrf.mxu2  ;;  %v1422_v47 = vld [vmem:[%s3632_s27 + $0x7c] sm:$0xff] }
 0x116   : >> { %v823_v56 = vpop.f32.mrf.mxu3  ;;  %2773 = vmatmul.msk.f32.gmra.mxu1 %vm339_vm0, %v1696_v27  ;;  %v1699_v27 = vld [vmem:[%s3632_s27 + $0x7d] sm:$0xff] }
 0x117   : >> { %v3994_v19 = vadd.f32 %v823_v56, %v580_v6  ;;  %v3997_v55 = vadd.f32 %v1052_v36, %v841_v33  ;;  %v1146_v36 = vld [vmem:[%s3632_s27 + $0x83] sm:$0xff] }
 0x11a   : >> { %v501_v16 = vpop.f32.mrf.mxu0  ;;  %2808 = vmatmul.msk.f32.gmra.mxu2 %vm339_vm0, %v1974_v37  ;;  %v1977_v37 = vld [vmem:[%s3632_s27 + $0x86] sm:$0xff] }
 0x11b   : >> { %2706 = vmatmul.msk.f32.gmra.mxu3 %vm339_vm0, %v1143_v3  ;;  %v778_v0 = vpop.f32.mrf.mxu1  ;;  %v565_v41 = vadd.f32 %v3346_v15, %v501_v16 }
 0x11d   : >> { %v842_v21 = vadd.f32 %v778_v0, %v565_v41  ;;  %2740 = vmatmul.msk.f32.gmra.mxu0 %vm339_vm0, %v1420_v59  ;;  %v1055_v5 = vpop.f32.mrf.mxu2  ;;  %v1423_v0 = vld [vmem:[%s3632_s27 + $0x84] sm:$0xff] }
 0x11e   : >> { %v1079_v42 = vpop.f32.mrf.mxu3  ;;  %2774 = vmatmul.msk.f32.gmra.mxu1 %vm339_vm0, %v1697_v39  ;;  %v1700_v59 = vld [vmem:[%s3632_s27 + $0x85] sm:$0xff] }
 0x11f   : >> { %v4008_v45 = vadd.f32 %v1079_v42, %v3889_v43  ;;  %v4011_v18 = vadd.f32 %v1055_v5, %v842_v21  ;;  %v1147_v5 = vld [vmem:[%s3632_s27 + $0x93] sm:$0xff] }
 0x122   : >> { %v504_v35 = vpop.f32.mrf.mxu0  ;;  %2809 = vmatmul.msk.f32.gmra.mxu2 %vm339_vm0, %v1975_v2  ;;  %v1978_v2 = vld [vmem:[%s3632_s27 + $0x96] sm:$0xff] }
 0x123   : >> { %2707 = vmatmul.msk.f32.gmra.mxu3 %vm339_vm0, %v1144_v23  ;;  %v781_v15 = vpop.f32.mrf.mxu1  ;;  %v566_v52 = vadd.f32 %v3342_v14, %v504_v35 }
 0x125   : >> { %v843_v53 = vadd.f32 %v781_v15, %v566_v52  ;;  %2741 = vmatmul.msk.f32.gmra.mxu0 %vm339_vm0, %v1421_v7  ;;  %v1058_v54 = vpop.f32.mrf.mxu2  ;;  %v1424_v15 = vld [vmem:[%s3632_s27 + $0x94] sm:$0xff] }
 0x126   : >> { %v1082_v43 = vpop.f32.mrf.mxu3  ;;  %2775 = vmatmul.msk.f32.gmra.mxu1 %vm339_vm0, %v1698_v46  ;;  %v1701_v7 = vld [vmem:[%s3632_s27 + $0x95] sm:$0xff] }
 0x127   : >> { %v4022_v20 = vadd.f32 %v1082_v43, %v3904_v58  ;;  %v4025_v62 = vadd.f32 %v1058_v54, %v843_v53  ;;  %v1148_v54 = vld [vmem:[%s3632_s27 + $0x9b] sm:$0xff] }
 0x12a   : >> { %v507_v1 = vpop.f32.mrf.mxu0  ;;  %2810 = vmatmul.msk.f32.gmra.mxu2 %vm339_vm0, %v1976_v17  ;;  %v1979_v17 = vld [vmem:[%s3632_s27 + $0x9e] sm:$0xff] }
 0x12b   : >> { %2708 = vmatmul.msk.f32.gmra.mxu3 %vm339_vm0, %v1145_v44  ;;  %v784_v14 = vpop.f32.mrf.mxu1  ;;  %v567_v22 = vadd.f32 %v3338_v13, %v507_v1 }
 0x12d   : >> { %v844_v6 = vadd.f32 %v784_v14, %v567_v22  ;;  %2742 = vmatmul.msk.f32.gmra.mxu0 %vm339_vm0, %v1422_v47  ;;  %v1061_v56 = vpop.f32.mrf.mxu2  ;;  %v1425_v14 = vld [vmem:[%s3632_s27 + $0x9c] sm:$0xff] }
 0x12e   : >> { %v1085_v58 = vpop.f32.mrf.mxu3  ;;  %2776 = vmatmul.msk.f32.gmra.mxu1 %vm339_vm0, %v1699_v27  ;;  %v1702_v47 = vld [vmem:[%s3632_s27 + $0x9d] sm:$0xff] }
 0x12f   : >> { %v4036_v33 = vadd.f32 %v1085_v58, %v3919_v29  ;;  %v4039_v3 = vadd.f32 %v1061_v56, %v844_v6  ;;  %v1149_v56 = vld [vmem:[%s3632_s27 + $0xab] sm:$0xff] }
 0x132   : >> { %v510_v16 = vpop.f32.mrf.mxu0  ;;  %2811 = vmatmul.msk.f32.gmra.mxu2 %vm339_vm0, %v1977_v37  ;;  %v1980_v37 = vld [vmem:[%s3632_s27 + $0xae] sm:$0xff] }
 0x133   : >> { %2709 = vmatmul.msk.f32.gmra.mxu3 %vm339_vm0, %v1146_v36  ;;  %v787_v13 = vpop.f32.mrf.mxu1  ;;  %v568_v39 = vadd.f32 %v3334_v12, %v510_v16 }
 0x135   : >> { %v845_v41 = vadd.f32 %v787_v13, %v568_v39  ;;  %2743 = vmatmul.msk.f32.gmra.mxu0 %vm339_vm0, %v1423_v0  ;;  %v1064_v42 = vpop.f32.mrf.mxu2  ;;  %v1426_v13 = vld [vmem:[%s3632_s27 + $0xac] sm:$0xff] }
 0x136   : >> { %v1088_v29 = vpop.f32.mrf.mxu3  ;;  %2777 = vmatmul.msk.f32.gmra.mxu1 %vm339_vm0, %v1700_v59  ;;  %v1703_v0 = vld [vmem:[%s3632_s27 + $0xad] sm:$0xff] }
 0x137   : >> { %v4050_v21 = vadd.f32 %v1088_v29, %v3934_v31  ;;  %v4053_v23 = vadd.f32 %v1064_v42, %v845_v41  ;;  %v1150_v42 = vld [vmem:[%s3632_s27 + $0xb3] sm:$0xff] }
 0x13a   : >> { %v513_v35 = vpop.f32.mrf.mxu0  ;;  %2812 = vmatmul.msk.f32.gmra.mxu2 %vm339_vm0, %v1978_v2  ;;  %v1981_v2 = vld [vmem:[%s3632_s27 + $0xb6] sm:$0xff] }
 0x13b   : >> { %2710 = vmatmul.msk.f32.gmra.mxu3 %vm339_vm0, %v1147_v5  ;;  %v790_v12 = vpop.f32.mrf.mxu1  ;;  %v569_v46 = vadd.f32 %v3330_v11, %v513_v35 }
 0x13d   : >> { %v846_v52 = vadd.f32 %v790_v12, %v569_v46  ;;  %2744 = vmatmul.msk.f32.gmra.mxu0 %vm339_vm0, %v1424_v15  ;;  %v1067_v43 = vpop.f32.mrf.mxu2  ;;  %v1427_v12 = vld [vmem:[%s3632_s27 + $0xb4] sm:$0xff] }
 0x13e   : >> { %v1091_v31 = vpop.f32.mrf.mxu3  ;;  %2778 = vmatmul.msk.f32.gmra.mxu1 %vm339_vm0, %v1701_v7  ;;  %v1704_v15 = vld [vmem:[%s3632_s27 + $0xb5] sm:$0xff] }
 0x13f   : >> { %v4064_v53 = vadd.f32 %v1091_v31, %v3949_v32  ;;  %v4067_v44 = vadd.f32 %v1067_v43, %v846_v52  ;;  %v1151_v43 = vld [vmem:[%s3632_s27 + $0xc3] sm:$0xff] }
 0x142   : >> { %v516_v1 = vpop.f32.mrf.mxu0  ;;  %2813 = vmatmul.msk.f32.gmra.mxu2 %vm339_vm0, %v1979_v17  ;;  %v1982_v17 = vld [vmem:[%s3632_s27 + $0xc6] sm:$0xff] }
 0x143   : >> { %2711 = vmatmul.msk.f32.gmra.mxu3 %vm339_vm0, %v1148_v54  ;;  %v793_v11 = vpop.f32.mrf.mxu1  ;;  %v570_v27 = vadd.f32 %v3326_v10, %v516_v1 }
 0x145   : >> { %v847_v22 = vadd.f32 %v793_v11, %v570_v27  ;;  %2745 = vmatmul.msk.f32.gmra.mxu0 %vm339_vm0, %v1425_v14  ;;  %v1070_v58 = vpop.f32.mrf.mxu2  ;;  %v1428_v11 = vld [vmem:[%s3632_s27 + $0xc4] sm:$0xff] }
 0x146   : >> { %v1094_v32 = vpop.f32.mrf.mxu3  ;;  %2779 = vmatmul.msk.f32.gmra.mxu1 %vm339_vm0, %v1702_v47  ;;  %v1705_v14 = vld [vmem:[%s3632_s27 + $0xc5] sm:$0xff] }
 0x147   : >> { %v4078_v6 = vadd.f32 %v1094_v32, %v3964_v34  ;;  %v4081_v36 = vadd.f32 %v1070_v58, %v847_v22  ;;  %v1152_v32 = vld [vmem:[%s3632_s27 + $0xcb] sm:$0xff] }
 0x148   : >> { %v1983_v22 = vld [vmem:[%s3632_s27 + $0xce] sm:$0xff] }
 0x14a   : >> { %v519_v16 = vpop.f32.mrf.mxu0  ;;  %2814 = vmatmul.msk.f32.gmra.mxu2 %vm339_vm0, %v1980_v37 }
 0x14b   : >> { %2712 = vmatmul.msk.f32.gmra.mxu3 %vm339_vm0, %v1149_v56  ;;  %v796_v10 = vpop.f32.mrf.mxu1  ;;  %v571_v59 = vadd.f32 %v3322_v9, %v519_v16 }
 0x14d   : >> { %v848_v39 = vadd.f32 %v796_v10, %v571_v59  ;;  %2746 = vmatmul.msk.f32.gmra.mxu0 %vm339_vm0, %v1426_v13  ;;  %v1073_v29 = vpop.f32.mrf.mxu2  ;;  %v1429_v10 = vld [vmem:[%s3632_s27 + $0xcc] sm:$0xff] }
 0x14e   : >> { %v1097_v34 = vpop.f32.mrf.mxu3  ;;  %2780 = vmatmul.msk.f32.gmra.mxu1 %vm339_vm0, %v1703_v0  ;;  %v1706_v13 = vld [vmem:[%s3632_s27 + $0xcd] sm:$0xff] }
 0x14f   : >> { %v4092_v41 = vadd.f32 %v1097_v34, %v3979_v4  ;;  %v4095_v5 = vadd.f32 %v1073_v29, %v848_v39  ;;  %v1153_v39 = vld [vmem:[%s3632_s27 + $0xdb] sm:$0xff] }
 0x150   : >> { %v1984_v29 = vld [vmem:[%s3632_s27 + $0xde] sm:$0xff] }
 0x152   : >> { %v522_v35 = vpop.f32.mrf.mxu0  ;;  %2815 = vmatmul.msk.f32.gmra.mxu2 %vm339_vm0, %v1981_v2 }
 0x153   : >> { %2713 = vmatmul.msk.f32.gmra.mxu3 %vm339_vm0, %v1150_v42  ;;  %v799_v9 = vpop.f32.mrf.mxu1  ;;  %v572_v7 = vadd.f32 %v3318_v8, %v522_v35 }
 0x155   : >> { %v849_v46 = vadd.f32 %v799_v9, %v572_v7  ;;  %2747 = vmatmul.msk.f32.gmra.mxu0 %vm339_vm0, %v1427_v12  ;;  %v1076_v31 = vpop.f32.mrf.mxu2  ;;  %v1430_v12 = vld [vmem:[%s3632_s27 + $0xdc] sm:$0xff] }
 0x156   : >> { %v1100_v4 = vpop.f32.mrf.mxu3  ;;  %2781 = vmatmul.msk.f32.gmra.mxu1 %vm339_vm0, %v1704_v15  ;;  %v1707_v15 = vld [vmem:[%s3632_s27 + $0xdd] sm:$0xff] }
 0x157   : >> { %v4106_v52 = vadd.f32 %v1100_v4, %v3994_v19  ;;  %v4109_v54 = vadd.f32 %v1076_v31, %v849_v46 }
 0x15a   : >> { %v1561_v1 = vpop.f32.mrf.mxu0  ;;  %2816 = vmatmul.msk.f32.gmra.mxu2 %vm339_vm0, %v1982_v17  ;;  %v1985_v17 = vld [vmem:[%s3632_s27 + $0xe6] sm:$0xff] }
 0x15b   : >> { %2714 = vmatmul.msk.f32.gmra.mxu3 %vm339_vm0, %v1151_v43  ;;  %v1838_v8 = vpop.f32.mrf.mxu1  ;;  %v1154_v43 = vld [vmem:[%s3632_s27 + $0xe3] sm:$0xff] }
 0x15d   : >> { %2748 = vmatmul.msk.f32.gmra.mxu0 %vm339_vm0, %v1428_v11  ;;  %v2115_v19 = vpop.f32.mrf.mxu2 }
 0x15e   : >> { %v1284_v47 = vpop.f32.mrf.mxu3  ;;  %2782 = vmatmul.msk.f32.gmra.mxu1 %vm339_vm0, %v1705_v14 }
 0x15f   : >> { %v1380_v27 = vadd.f32 %v1284_v47, %v3786_v50  ;;  %v1431_v47 = vld [vmem:[%s3632_s27 + $0xe4] sm:$0xff] }
 0x161   : >> { %v1657_v58 = vadd.f32 %v1561_v1, %v1380_v27 }
 0x162   : >> { %v1564_v37 = vpop.f32.mrf.mxu0  ;;  %2817 = vmatmul.msk.f32.gmra.mxu2 %vm339_vm0, %v1983_v22 }
 0x163   : >> { %v1934_v56 = vadd.f32 %v1838_v8, %v1657_v58  ;;  %2715 = vmatmul.msk.f32.gmra.mxu3 %vm339_vm0, %v1152_v32  ;;  %v1841_v16 = vpop.f32.mrf.mxu1  ;;  %v1155_v58 = vld [vmem:[%s3632_s27 + $0xf3] sm:$0xff] }
 0x165   : >> { %v4125_v31 = vadd.f32 %v2115_v19, %v1934_v56   ;;  %2749 = vmatmul.msk.f32.gmra.mxu0 %vm339_vm0, %v1429_v10  ;;  %v2118_v50 = vpop.f32.mrf.mxu2  ;;  %v1708_v19 = vld [vmem:[%s3632_s27 + $0xe5] sm:$0xff]  ;;  %v1986_v56 = vld [vmem:[%s3632_s27 + $0xf6] sm:$0xff] }
 0x166   : >> { %v1287_v0 = vpop.f32.mrf.mxu3  ;;  %2783 = vmatmul.msk.f32.gmra.mxu1 %vm339_vm0, %v1706_v13 }
 0x167   : >> { %4559 = vst [vmem:[#allocation2_spill] sm:$0xff] %v4125_v31  ;;  %v1381_v34 = vadd.f32 %v1287_v0, %v3799_v60  ;;  %v1432_v0 = vld [vmem:[%s3632_s27 + $0xf4] sm:$0xff] }
 0x169   : >> { %v1658_v42 = vadd.f32 %v1564_v37, %v1381_v34 }
 0x16a   : >> { %v1567_v35 = vpop.f32.mrf.mxu0  ;;  %2818 = vmatmul.msk.f32.gmra.mxu2 %vm339_vm0, %v1984_v29 }
 0x16b   : >> { %v1935_v2 = vadd.f32 %v1841_v16, %v1658_v42  ;;  %2716 = vmatmul.msk.f32.gmra.mxu3 %vm339_vm0, %v1153_v39  ;;  %v1844_v9 = vpop.f32.mrf.mxu1  ;;  %v1156_v42 = vld [vmem:[%s3632_s27 + $0xfb] sm:$0xff] }
 0x16d   : >> { %v4136_v7 = vadd.f32 %v2118_v50, %v1935_v2   ;;  %2750 = vmatmul.msk.f32.gmra.mxu0 %vm339_vm0, %v1430_v12  ;;  %v2121_v60 = vpop.f32.mrf.mxu2  ;;  %v1709_v50 = vld [vmem:[%s3632_s27 + $0xf5] sm:$0xff]  ;;  %v1987_v2 = vld [vmem:[%s3632_s27 + $0xfe] sm:$0xff] }
 0x16e   : >> { %v1290_v4 = vpop.f32.mrf.mxu3  ;;  %2784 = vmatmul.msk.f32.gmra.mxu1 %vm339_vm0, %v1707_v15 }
 0x16f   : >> { %4560 = vst [vmem:[#allocation3_spill] sm:$0xff] %v4136_v7  ;;  %v1382_v31 = vadd.f32 %v1290_v4, %v3812_v38  ;;  %v1433_v7 = vld [vmem:[%s3632_s27 + $0xfc] sm:$0xff] }
 0x170   : >> { %v1710_v4 = vld [vmem:[%s3632_s27 + $0xfd] sm:$0xff] }
 0x171   : >> { %v1659_v1 = vadd.f32 %v1567_v35, %v1382_v31 }
 0x172   : >> { %v1570_v11 = vpop.f32.mrf.mxu0  ;;  %2819 = vmatmul.msk.f32.gmra.mxu2 %vm339_vm0, %v1985_v17  ;;  %v1157_v17 = vld [vmem:[%s3632_s27 + $0x10b] sm:$0xff] }
 0x173   : >> { %v1936_v8 = vadd.f32 %v1844_v9, %v1659_v1  ;;  %2717 = vmatmul.msk.f32.gmra.mxu3 %vm339_vm0, %v1154_v43  ;;  %v1847_v14 = vpop.f32.mrf.mxu1  ;;  %v1988_v1 = vld [vmem:[%s3632_s27 + $0x10e] sm:$0xff] }
 0x175   : >> { %v4147_v29 = vadd.f32 %v2121_v60, %v1936_v8   ;;  %2751 = vmatmul.msk.f32.gmra.mxu0 %vm339_vm0, %v1431_v47  ;;  %v2124_v38 = vpop.f32.mrf.mxu2 }
 0x176   : >> { %v1293_v27 = vpop.f32.mrf.mxu3  ;;  %2785 = vmatmul.msk.f32.gmra.mxu1 %vm339_vm0, %v1708_v19  ;;  %v1434_v19 = vld [vmem:[%s3632_s27 + $0x10c] sm:$0xff] }
 0x177   : >> { %4561 = vst [vmem:[#allocation4_spill] sm:$0xff] %v4147_v29  ;;  %v1383_v22 = vadd.f32 %v1293_v27, %v3825_v49 }
 0x179   : >> { %v1660_v37 = vadd.f32 %v1570_v11, %v1383_v22 }
 0x17a   : >> { %v1573_v10 = vpop.f32.mrf.mxu0  ;;  %2820 = vmatmul.msk.f32.gmra.mxu2 %vm339_vm0, %v1986_v56  ;;  %v1158_v56 = vld [vmem:[%s3632_s27 + $0x113] sm:$0xff] }
 0x17b   : >> { %v1937_v16 = vadd.f32 %v1847_v14, %v1660_v37  ;;  %2718 = vmatmul.msk.f32.gmra.mxu3 %vm339_vm0, %v1155_v58  ;;  %v1850_v13 = vpop.f32.mrf.mxu1  ;;  %v1989_v37 = vld [vmem:[%s3632_s27 + $0x116] sm:$0xff] }
 0x17d   : >> { %v4158_v34 = vadd.f32 %v2124_v38, %v1937_v16   ;;  %2752 = vmatmul.msk.f32.gmra.mxu0 %vm339_vm0, %v1432_v0  ;;  %v2127_v49 = vpop.f32.mrf.mxu2 }
 0x17e   : >> { %v1296_v39 = vpop.f32.mrf.mxu3  ;;  %2786 = vmatmul.msk.f32.gmra.mxu1 %vm339_vm0, %v1709_v50  ;;  %v1435_v50 = vld [vmem:[%s3632_s27 + $0x114] sm:$0xff] }
 0x17f   : >> { %v1384_v29 = vadd.f32 %v1296_v39, %v3838_v61  ;;  %v1712_v39 = vld [vmem:[%s3632_s27 + $0x115] sm:$0xff] }
 0x181   : >> { %v1661_v35 = vadd.f32 %v1573_v10, %v1384_v29 }
 0x182   : >> { %v1576_v12 = vpop.f32.mrf.mxu0  ;;  %2821 = vmatmul.msk.f32.gmra.mxu2 %vm339_vm0, %v1987_v2  ;;  %v1159_v2 = vld [vmem:[%s3632_s27 + $0x123] sm:$0xff] }
 0x183   : >> { %v1938_v9 = vadd.f32 %v1850_v13, %v1661_v35  ;;  %2719 = vmatmul.msk.f32.gmra.mxu3 %vm339_vm0, %v1156_v42  ;;  %v1853_v15 = vpop.f32.mrf.mxu1  ;;  %v1990_v35 = vld [vmem:[%s3632_s27 + $0x126] sm:$0xff] }
 0x185   : >> { %v4169_v27 = vadd.f32 %v2127_v49, %v1938_v9   ;;  %2753 = vmatmul.msk.f32.gmra.mxu0 %vm339_vm0, %v1433_v7  ;;  %v2130_v61 = vpop.f32.mrf.mxu2 }
 0x186   : >> { %v1299_v31 = vpop.f32.mrf.mxu3  ;;  %2787 = vmatmul.msk.f32.gmra.mxu1 %vm339_vm0, %v1710_v4  ;;  %v1436_v4 = vld [vmem:[%s3632_s27 + $0x124] sm:$0xff] }
 0x187   : >> { %v4562_v60 = vmov %v4169_v27  ;;  %v1385_v43 = vadd.f32 %v1299_v31, %v3851_v40  ;;  %v1711_v27 = vld [vmem:[%s3632_s27 + $0x10d] sm:$0xff]  ;;  %v1713_v31 = vld [vmem:[%s3632_s27 + $0x125] sm:$0xff] }
 0x189   : >> { %v1662_v8 = vadd.f32 %v1576_v12, %v1385_v43 }
 0x18a   : >> { %v1579_v14 = vpop.f32.mrf.mxu0  ;;  %2822 = vmatmul.msk.f32.gmra.mxu2 %vm339_vm0, %v1988_v1  ;;  %v1160_v1 = vld [vmem:[%s3632_s27 + $0x12b] sm:$0xff] }
 0x18b   : >> { %v1939_v11 = vadd.f32 %v1853_v15, %v1662_v8  ;;  %2720 = vmatmul.msk.f32.gmra.mxu3 %vm339_vm0, %v1157_v17  ;;  %v1856_v47 = vpop.f32.mrf.mxu1  ;;  %v1991_v8 = vld [vmem:[%s3632_s27 + $0x12e] sm:$0xff] }
 0x18d   : >> { %v4180_v38 = vadd.f32 %v2130_v61, %v1939_v11   ;;  %2754 = vmatmul.msk.f32.gmra.mxu0 %vm339_vm0, %v1434_v19  ;;  %v2133_v40 = vpop.f32.mrf.mxu2 }
 0x18e   : >> { %v1302_v22 = vpop.f32.mrf.mxu3  ;;  %2788 = vmatmul.msk.f32.gmra.mxu1 %vm339_vm0, %v1711_v27  ;;  %v1437_v27 = vld [vmem:[%s3632_s27 + $0x12c] sm:$0xff] }
 0x18f   : >> { %v1386_v58 = vadd.f32 %v1302_v22, %v3864_v28  ;;  %v1714_v22 = vld [vmem:[%s3632_s27 + $0x12d] sm:$0xff] }
 0x191   : >> { %v1663_v16 = vadd.f32 %v1579_v14, %v1386_v58 }
 0x192   : >> { %v1582_v13 = vpop.f32.mrf.mxu0  ;;  %2823 = vmatmul.msk.f32.gmra.mxu2 %vm339_vm0, %v1989_v37  ;;  %v1161_v37 = vld [vmem:[%s3632_s27 + $0x13b] sm:$0xff] }
 0x193   : >> { %v1940_v10 = vadd.f32 %v1856_v47, %v1663_v16  ;;  %2721 = vmatmul.msk.f32.gmra.mxu3 %vm339_vm0, %v1158_v56  ;;  %v1859_v0 = vpop.f32.mrf.mxu1  ;;  %v1992_v16 = vld [vmem:[%s3632_s27 + $0x13e] sm:$0xff] }
 0x195   : >> { %v4191_v49 = vadd.f32 %v2133_v40, %v1940_v10   ;;  %2755 = vmatmul.msk.f32.gmra.mxu0 %vm339_vm0, %v1435_v50  ;;  %v2136_v28 = vpop.f32.mrf.mxu2 }
 0x196   : >> { %v1305_v29 = vpop.f32.mrf.mxu3  ;;  %2789 = vmatmul.msk.f32.gmra.mxu1 %vm339_vm0, %v1712_v39  ;;  %v1438_v39 = vld [vmem:[%s3632_s27 + $0x13c] sm:$0xff] }
 0x197   : >> { %v1387_v42 = vadd.f32 %v1305_v29, %v3877_v63  ;;  %v1715_v29 = vld [vmem:[%s3632_s27 + $0x13d] sm:$0xff] }
 0x199   : >> { %v1664_v9 = vadd.f32 %v1582_v13, %v1387_v42 }
 0x19a   : >> { %v1585_v15 = vpop.f32.mrf.mxu0  ;;  %2824 = vmatmul.msk.f32.gmra.mxu2 %vm339_vm0, %v1990_v35  ;;  %v1162_v35 = vld [vmem:[%s3632_s27 + $0x143] sm:$0xff] }
 0x19b   : >> { %v1941_v12 = vadd.f32 %v1859_v0, %v1664_v9  ;;  %2722 = vmatmul.msk.f32.gmra.mxu3 %vm339_vm0, %v1159_v2  ;;  %v1862_v7 = vpop.f32.mrf.mxu1  ;;  %v1993_v9 = vld [vmem:[%s3632_s27 + $0x146] sm:$0xff] }
 0x19d   : >> { %v4202_v61 = vadd.f32 %v2136_v28, %v1941_v12   ;;  %2756 = vmatmul.msk.f32.gmra.mxu0 %vm339_vm0, %v1436_v4  ;;  %v2139_v63 = vpop.f32.mrf.mxu2 }
 0x19e   : >> { %v1308_v43 = vpop.f32.mrf.mxu3  ;;  %2790 = vmatmul.msk.f32.gmra.mxu1 %vm339_vm0, %v1713_v31  ;;  %v1439_v31 = vld [vmem:[%s3632_s27 + $0x144] sm:$0xff] }
 0x19f   : >> { %v1388_v17 = vadd.f32 %v1308_v43, %v3892_v48  ;;  %v1716_v43 = vld [vmem:[%s3632_s27 + $0x145] sm:$0xff] }
 0x1a1   : >> { %v1665_v11 = vadd.f32 %v1585_v15, %v1388_v17 }
 0x1a2   : >> { %v1588_v47 = vpop.f32.mrf.mxu0  ;;  %2825 = vmatmul.msk.f32.gmra.mxu2 %vm339_vm0, %v1991_v8  ;;  %v1163_v8 = vld [vmem:[%s3632_s27 + $0x153] sm:$0xff] }
 0x1a3   : >> { %v1942_v14 = vadd.f32 %v1862_v7, %v1665_v11  ;;  %2723 = vmatmul.msk.f32.gmra.mxu3 %vm339_vm0, %v1160_v1  ;;  %v1865_v19 = vpop.f32.mrf.mxu1  ;;  %v1994_v11 = vld [vmem:[%s3632_s27 + $0x156] sm:$0xff] }
 0x1a5   : >> { %v4213_v40 = vadd.f32 %v2139_v63, %v1942_v14   ;;  %2757 = vmatmul.msk.f32.gmra.mxu0 %vm339_vm0, %v1437_v27  ;;  %v2142_v48 = vpop.f32.mrf.mxu2 }
 0x1a6   : >> { %v1311_v58 = vpop.f32.mrf.mxu3  ;;  %2791 = vmatmul.msk.f32.gmra.mxu1 %vm339_vm0, %v1714_v22 }
 0x1a7   : >> { %v1389_v56 = vadd.f32 %v1311_v58, %v3907_v30  ;;  %v1717_v58 = vld [vmem:[%s3632_s27 + $0x155] sm:$0xff] }
 0x1a9   : >> { %v1666_v10 = vadd.f32 %v1588_v47, %v1389_v56 }
 0x1aa   : >> { %v1591_v0 = vpop.f32.mrf.mxu0  ;;  %2826 = vmatmul.msk.f32.gmra.mxu2 %vm339_vm0, %v1992_v16  ;;  %v1164_v16 = vld [vmem:[%s3632_s27 + $0x15b] sm:$0xff] }
 0x1ab   : >> { %v1943_v13 = vadd.f32 %v1865_v19, %v1666_v10  ;;  %2724 = vmatmul.msk.f32.gmra.mxu3 %vm339_vm0, %v1161_v37  ;;  %v1868_v50 = vpop.f32.mrf.mxu1  ;;  %v1995_v10 = vld [vmem:[%s3632_s27 + $0x15e] sm:$0xff] }
 0x1ad   : >> { %v4224_v22 = vadd.f32 %v2142_v48, %v1943_v13   ;;  %2758 = vmatmul.msk.f32.gmra.mxu0 %vm339_vm0, %v1438_v39  ;;  %v2145_v30 = vpop.f32.mrf.mxu2 }
 0x1ae   : >> { %v1314_v28 = vpop.f32.mrf.mxu3  ;;  %2792 = vmatmul.msk.f32.gmra.mxu1 %vm339_vm0, %v1715_v29  ;;  %v1441_v29 = vld [vmem:[%s3632_s27 + $0x15c] sm:$0xff] }
 0x1af   : >> { %v4563_v42 = vmov %v4224_v22  ;;  %v1390_v2 = vadd.f32 %v1314_v28, %v3922_v26  ;;  %v1440_v22 = vld [vmem:[%s3632_s27 + $0x154] sm:$0xff]  ;;  %v1718_v28 = vld [vmem:[%s3632_s27 + $0x15d] sm:$0xff] }
 0x1b1   : >> { %v1667_v12 = vadd.f32 %v1591_v0, %v1390_v2 }
 0x1b2   : >> { %v1594_v7 = vpop.f32.mrf.mxu0  ;;  %2827 = vmatmul.msk.f32.gmra.mxu2 %vm339_vm0, %v1993_v9  ;;  %v1165_v9 = vld [vmem:[%s3632_s27 + $0x16b] sm:$0xff] }
 0x1b3   : >> { %v1944_v15 = vadd.f32 %v1868_v50, %v1667_v12  ;;  %2725 = vmatmul.msk.f32.gmra.mxu3 %vm339_vm0, %v1162_v35  ;;  %v1871_v4 = vpop.f32.mrf.mxu1  ;;  %v1996_v12 = vld [vmem:[%s3632_s27 + $0x16e] sm:$0xff] }
 0x1b5   : >> { %v4235_v63 = vadd.f32 %v2145_v30, %v1944_v15   ;;  %2759 = vmatmul.msk.f32.gmra.mxu0 %vm339_vm0, %v1439_v31  ;;  %v2148_v26 = vpop.f32.mrf.mxu2 }
 0x1b6   : >> { %v1317_v17 = vpop.f32.mrf.mxu3  ;;  %2793 = vmatmul.msk.f32.gmra.mxu1 %vm339_vm0, %v1716_v43  ;;  %v1442_v43 = vld [vmem:[%s3632_s27 + $0x16c] sm:$0xff] }
 0x1b7   : >> { %v1391_v1 = vadd.f32 %v1317_v17, %v3937_v25  ;;  %v1719_v17 = vld [vmem:[%s3632_s27 + $0x16d] sm:$0xff] }
 0x1b9   : >> { %v1668_v14 = vadd.f32 %v1594_v7, %v1391_v1 }
 0x1ba   : >> { %v1597_v19 = vpop.f32.mrf.mxu0  ;;  %2828 = vmatmul.msk.f32.gmra.mxu2 %vm339_vm0, %v1994_v11  ;;  %v1166_v11 = vld [vmem:[%s3632_s27 + $0x173] sm:$0xff] }
 0x1bb   : >> { %v1945_v47 = vadd.f32 %v1871_v4, %v1668_v14  ;;  %2726 = vmatmul.msk.f32.gmra.mxu3 %vm339_vm0, %v1163_v8  ;;  %v1874_v27 = vpop.f32.mrf.mxu1  ;;  %v1997_v14 = vld [vmem:[%s3632_s27 + $0x176] sm:$0xff] }
 0x1bd   : >> { %v4246_v48 = vadd.f32 %v2148_v26, %v1945_v47   ;;  %2760 = vmatmul.msk.f32.gmra.mxu0 %vm339_vm0, %v1440_v22  ;;  %v2151_v25 = vpop.f32.mrf.mxu2 }
 0x1be   : >> { %v1320_v56 = vpop.f32.mrf.mxu3  ;;  %2794 = vmatmul.msk.f32.gmra.mxu1 %vm339_vm0, %v1717_v58 }
 0x1bf   : >> { %v1392_v37 = vadd.f32 %v1320_v56, %v3952_v24  ;;  %v1443_v56 = vld [vmem:[%s3632_s27 + $0x174] sm:$0xff] }
 0x1c1   : >> { %v1669_v13 = vadd.f32 %v1597_v19, %v1392_v37 }
 0x1c2   : >> { %v1600_v50 = vpop.f32.mrf.mxu0  ;;  %2829 = vmatmul.msk.f32.gmra.mxu2 %vm339_vm0, %v1995_v10 }
 0x1c3   : >> { %v1946_v0 = vadd.f32 %v1874_v27, %v1669_v13  ;;  %2727 = vmatmul.msk.f32.gmra.mxu3 %vm339_vm0, %v1164_v16  ;;  %v1877_v39 = vpop.f32.mrf.mxu1 }
 0x1c5   : >> { %v4257_v19 = vadd.f32 %v2151_v25, %v1946_v0   ;;  %2761 = vmatmul.msk.f32.gmra.mxu0 %vm339_vm0, %v1441_v29  ;;  %v2154_v24 = vpop.f32.mrf.mxu2  ;;  %v1720_v25 = vld [vmem:[%s3632_s27 + $0x175] sm:$0xff] }
 0x1c6   : >> { %v1323_v30 = vpop.f32.mrf.mxu3  ;;  %2795 = vmatmul.msk.f32.gmra.mxu1 %vm339_vm0, %v1718_v28 }
 0x1c7   : >> { %v4564_v35 = vmov %v4257_v19  ;;  %v1393_v2 = vadd.f32 %v1323_v30, %v3967_v51 }
 0x1c9   : >> { %v1670_v15 = vadd.f32 %v1600_v50, %v1393_v2 }
 0x1ca   : >> { %v1603_v4 = vpop.f32.mrf.mxu0  ;;  %2830 = vmatmul.msk.f32.gmra.mxu2 %vm339_vm0, %v1996_v12 }
 0x1cb   : >> { %v1947_v7 = vadd.f32 %v1877_v39, %v1670_v15  ;;  %2728 = vmatmul.msk.f32.gmra.mxu3 %vm339_vm0, %v1165_v9  ;;  %v1880_v31 = vpop.f32.mrf.mxu1 }
 0x1cd   : >> { %v4268_v26 = vadd.f32 %v2154_v24, %v1947_v7   ;;  %2762 = vmatmul.msk.f32.gmra.mxu0 %vm339_vm0, %v1442_v43  ;;  %v2157_v51 = vpop.f32.mrf.mxu2 }
 0x1ce   : >> { %v1326_v1 = vpop.f32.mrf.mxu3  ;;  %2796 = vmatmul.msk.f32.gmra.mxu1 %vm339_vm0, %v1719_v17 }
 0x1cf   : >> { %v4565_v47 = vmov %v4268_v26  ;;  %v1394_v8 = vadd.f32 %v1326_v1, %v3982_v57 }
 0x1d1   : >> { %v1671_v19 = vadd.f32 %v1603_v4, %v1394_v8 }
 0x1d2   : >> { %v1606_v22 = vpop.f32.mrf.mxu0  ;;  %2831 = vmatmul.msk.f32.gmra.mxu2 %vm339_vm0, %v1997_v14 }
 0x1d3   : >> { %v1948_v27 = vadd.f32 %v1880_v31, %v1671_v19  ;;  %2729 = vmatmul.msk.f32.gmra.mxu3 %vm339_vm0, %v1166_v11  ;;  %v1883_v58 = vpop.f32.mrf.mxu1 }
 0x1d5   : >> { %v4279_v17 = vadd.f32 %v2157_v51, %v1948_v27   ;;  %2763 = vmatmul.msk.f32.gmra.mxu0 %vm339_vm0, %v1443_v56  ;;  %v2160_v10 = vpop.f32.mrf.mxu2 }
 0x1d6   : >> { %v1329_v16 = vpop.f32.mrf.mxu3  ;;  %2797 = vmatmul.msk.f32.gmra.mxu1 %vm339_vm0, %v1720_v25 }
 0x1d7   : >> { %v4566_v37 = vmov %v4279_v17  ;;  %v1395_v57 = vadd.f32 %v1329_v16, %v3997_v55 }
 0x1d9   : >> { %v1672_v13 = vadd.f32 %v1606_v22, %v1395_v57 }
 0x1da   : >> { %v1609_v50 = vpop.f32.mrf.mxu0 }
 0x1db   : >> { %v1949_v0 = vadd.f32 %v1883_v58, %v1672_v13  ;;  %v1886_v39 = vpop.f32.mrf.mxu1 }
 0x1dd   : >> { %v4284_v16 = vadd.f32 %v2160_v10, %v1949_v0   ;;  %v2163_v28 = vpop.f32.mrf.mxu2 }
 0x1de   : >> { %v1332_v29 = vpop.f32.mrf.mxu3 }
 0x1df   : >> { %v4567_v43 = vmov %v4284_v16  ;;  %v1396_v30 = vadd.f32 %v1332_v29, %v4011_v18 }
 0x1e1   : >> { %v1673_v24 = vadd.f32 %v1609_v50, %v1396_v30 }
 0x1e2   : >> { %v1612_v9 = vpop.f32.mrf.mxu0 }
 0x1e3   : >> { %v1950_v2 = vadd.f32 %v1886_v39, %v1673_v24  ;;  %v1889_v12 = vpop.f32.mrf.mxu1 }
 0x1e5   : >> { %v4287_v15 = vadd.f32 %v2163_v28, %v1950_v2   ;;  %v2166_v4 = vpop.f32.mrf.mxu2 }
 0x1e6   : >> { %v1335_v7 = vpop.f32.mrf.mxu3 }
 0x1e7   : >> { %v4568_v51 = vmov %v4287_v15  ;;  %v1397_v55 = vadd.f32 %v1335_v7, %v4025_v62 }
 0x1e9   : >> { %v1674_v31 = vadd.f32 %v1612_v9, %v1397_v55 }
 0x1ea   : >> { %v1615_v26 = vpop.f32.mrf.mxu0 }
 0x1eb   : >> { %v1951_v17 = vadd.f32 %v1889_v12, %v1674_v31  ;;  %v1892_v1 = vpop.f32.mrf.mxu1 }
 0x1ed   : >> { %v4290_v14 = vadd.f32 %v2166_v4, %v1951_v17   ;;  %v2169_v11 = vpop.f32.mrf.mxu2 }
 0x1ee   : >> { %v1338_v8 = vpop.f32.mrf.mxu3 }
 0x1ef   : >> { %v4569_v58 = vmov %v4290_v14  ;;  %v1398_v18 = vadd.f32 %v1338_v8, %v4039_v3 }
 0x1f1   : >> { %v1675_v19 = vadd.f32 %v1615_v26, %v1398_v18 }
 0x1f2   : >> { %v1618_v22 = vpop.f32.mrf.mxu0 }
 0x1f3   : >> { %v1952_v27 = vadd.f32 %v1892_v1, %v1675_v19  ;;  %v1895_v56 = vpop.f32.mrf.mxu1 }
 0x1f5   : >> { %v4293_v13 = vadd.f32 %v2169_v11, %v1952_v27   ;;  %v2172_v25 = vpop.f32.mrf.mxu2 }
 0x1f6   : >> { %v1341_v15 = vpop.f32.mrf.mxu3 }
 0x1f7   : >> { %v4570_v57 = vmov %v4293_v13  ;;  %v1399_v62 = vadd.f32 %v1341_v15, %v4053_v23 }
 0x1f9   : >> { %v1676_v16 = vadd.f32 %v1618_v22, %v1399_v62 }
 0x1fa   : >> { %v1621_v0 = vpop.f32.mrf.mxu0 }
 0x1fb   : >> { %v1953_v10 = vadd.f32 %v1895_v56, %v1676_v16  ;;  %v1898_v50 = vpop.f32.mrf.mxu1 }
 0x1fd   : >> { %v4296_v12 = vadd.f32 %v2172_v25, %v1953_v10   ;;  %v2175_v29 = vpop.f32.mrf.mxu2 }
 0x1fe   : >> { %v1344_v14 = vpop.f32.mrf.mxu3 }
 0x1ff   : >> { %v4571_v39 = vmov %v4296_v12  ;;  %v1400_v3 = vadd.f32 %v1344_v14, %v4067_v44 }
 0x201   : >> { %v1677_v28 = vadd.f32 %v1621_v0, %v1400_v3 }
 0x202   : >> { %v1624_v24 = vpop.f32.mrf.mxu0 }
 0x203   : >> { %v1954_v30 = vadd.f32 %v1898_v50, %v1677_v28  ;;  %v1901_v2 = vpop.f32.mrf.mxu1 }
 0x205   : >> { %v4299_v11 = vadd.f32 %v2175_v29, %v1954_v30   ;;  %v2178_v9 = vpop.f32.mrf.mxu2 }
 0x206   : >> { %v1347_v13 = vpop.f32.mrf.mxu3 }
 0x207   : >> { %v4572_v55 = vmov %v4299_v11  ;;  %v1401_v23 = vadd.f32 %v1347_v13, %v4081_v36 }
 0x209   : >> { %v1678_v7 = vadd.f32 %v1624_v24, %v1401_v23 }
 0x20a   : >> { %v1627_v31 = vpop.f32.mrf.mxu0 }
 0x20b   : >> { %v1955_v4 = vadd.f32 %v1901_v2, %v1678_v7  ;;  %v1904_v17 = vpop.f32.mrf.mxu1 }
 0x20d   : >> { %v4302_v10 = vadd.f32 %v2178_v9, %v1955_v4   ;;  %v2181_v26 = vpop.f32.mrf.mxu2 }
 0x20e   : >> { %v1350_v12 = vpop.f32.mrf.mxu3 }
 0x20f   : >> { %v4573_v56 = vmov %v4302_v10  ;;  %v1402_v44 = vadd.f32 %v1350_v12, %v4095_v5 }
 0x211   : >> { %v1679_v1 = vadd.f32 %v1627_v31, %v1402_v44 }
 0x212   : >> { %v1630_v18 = vpop.f32.mrf.mxu0 }
 0x213   : >> { %v1956_v8 = vadd.f32 %v1904_v17, %v1679_v1  ;;  %v1907_v19 = vpop.f32.mrf.mxu1 }
 0x215   : >> { %v4305_v9 = vadd.f32 %v2181_v26, %v1956_v8   ;;  %v2184_v27 = vpop.f32.mrf.mxu2 }
 0x216   : >> { %v1353_v11 = vpop.f32.mrf.mxu3 }
 0x217   : >> { %v4574_v62 = vmov %v4305_v9  ;;  %v1403_v36 = vadd.f32 %v1353_v11, %v4109_v54 }
 0x219   : >> { %v1680_v22 = vadd.f32 %v1630_v18, %v1403_v36 }
 0x21a   : >> { %v1633_v25 = vpop.f32.mrf.mxu0 }
 0x21b   : >> { %v1957_v15 = vadd.f32 %v1907_v19, %v1680_v22  ;;  %v1910_v16 = vpop.f32.mrf.mxu1 }
 0x21d   : >> { %v4308_v8 = vadd.f32 %v2184_v27, %v1957_v15   ;;  %v2187_v0 = vpop.f32.mrf.mxu2 }
 0x21e   : >> { %v1356_v10 = vpop.f32.mrf.mxu3 }
 0x21f   : >> { %v4575_v50 = vmov %v4308_v8  ;;  %v1404_v5 = vadd.f32 %v1356_v10, %v4008_v45 }
 0x221   : >> { %v1681_v14 = vadd.f32 %v1633_v25, %v1404_v5 }
 0x222   : >> { %v1636_v3 = vpop.f32.mrf.mxu0 }
 0x223   : >> { %v1958_v29 = vadd.f32 %v1910_v16, %v1681_v14  ;;  %v1913_v28 = vpop.f32.mrf.mxu1 }
 0x225   : >> { %v4311_v7 = vadd.f32 %v2187_v0, %v1958_v29   ;;  %v2190_v24 = vpop.f32.mrf.mxu2 }
 0x226   : >> { %v1359_v30 = vpop.f32.mrf.mxu3 }
 0x227   : >> { %v4576_v44 = vmov %v4311_v7  ;;  %v1405_v54 = vadd.f32 %v1359_v30, %v4022_v20 }
 0x229   : >> { %v1682_v2 = vadd.f32 %v1636_v3, %v1405_v54 }
 0x22a   : >> { %v1639_v9 = vpop.f32.mrf.mxu0 }
 0x22b   : >> { %v1959_v13 = vadd.f32 %v1913_v28, %v1682_v2  ;;  %v1916_v23 = vpop.f32.mrf.mxu1 }
 0x22d   : >> { %v4314_v4 = vadd.f32 %v2190_v24, %v1959_v13   ;;  %v2193_v17 = vpop.f32.mrf.mxu2 }
 0x22e   : >> { %v1362_v31 = vpop.f32.mrf.mxu3 }
 0x22f   : >> { %v4577_v36 = vmov %v4314_v4  ;;  %v1406_v45 = vadd.f32 %v1362_v31, %v4036_v33 }
 0x231   : >> { %v1683_v12 = vadd.f32 %v1639_v9, %v1406_v45 }
 0x232   : >> { %v1642_v1 = vpop.f32.mrf.mxu0 }
 0x233   : >> { %v1960_v26 = vadd.f32 %v1916_v23, %v1683_v12  ;;  %v1919_v8 = vpop.f32.mrf.mxu1 }
 0x235   : >> { %v4317_v5 = vadd.f32 %v2193_v17, %v1960_v26   ;;  %v2196_v18 = vpop.f32.mrf.mxu2 }
 0x236   : >> { %v1365_v7 = vpop.f32.mrf.mxu3 }
 0x237   : >> { %v4578_v59 = vmov %v4317_v5  ;;  %v1407_v20 = vadd.f32 %v1365_v7, %v4050_v21 }
 0x239   : >> { %v1684_v19 = vadd.f32 %v1642_v1, %v1407_v20  ;;  %v4612_v20 = vmov %v4246_v48 }
 0x23a   : >> { %v1645_v27 = vpop.f32.mrf.mxu0 }
 0x23b   : >> { %v1961_v11 = vadd.f32 %v1919_v8, %v1684_v19  ;;  %v1922_v22 = vpop.f32.mrf.mxu1  ;;  %v4611_v19 = vmov %v4564_v35 }
 0x23d   : >> { %v4320_v4 = vadd.f32 %v2196_v18, %v1961_v11   ;;  %v2199_v25 = vpop.f32.mrf.mxu2  ;;  %v4603_v11 = vmov %v4572_v55  ;;  %v4610_v18 = vmov %v4565_v47 }
 0x23e   : >> { %v1368_v15 = vpop.f32.mrf.mxu3 }
 0x23f   : >> { %v4579_v54 = vmov %v4320_v4  ;;  %v1408_v33 = vadd.f32 %v1368_v15, %v4064_v53  ;;  %v4607_v15 = vmov %v4568_v51 }
 0x241   : >> { %v1685_v16 = vadd.f32 %v1645_v27, %v1408_v33  ;;  %v4619_v27 = vmov %v4562_v60 }
 0x242   : >> { %v1648_v0 = vpop.f32.mrf.mxu0 }
 0x243   : >> { %v1962_v10 = vadd.f32 %v1922_v22, %v1685_v16  ;;  %v1925_v14 = vpop.f32.mrf.mxu1  ;;  %v4608_v16 = vmov %v4567_v43  ;;  %v4614_v22 = vmov %v4563_v42 }
 0x245   : >> { %v4323_v3 = vadd.f32 %v2199_v25, %v1962_v10   ;;  %v2202_v29 = vpop.f32.mrf.mxu2  ;;  %v4602_v10 = vmov %v4573_v56  ;;  %v4617_v25 = vmov %v4191_v49 }
 0x246   : >> { %v1371_v5 = vpop.f32.mrf.mxu3 }
 0x247   : >> { %4580 = vst [vmem:[#allocation5_spill] sm:$0xff] %v4323_v3  ;;  %v4581_v45 = vmov %v4323_v3  ;;  %v1409_v21 = vadd.f32 %v1371_v5, %v4078_v6  ;;  %v4597_v5 = vmov %v4578_v59 }
 0x249   : >> { %v1686_v28 = vadd.f32 %v1648_v0, %v1409_v21  ;;  %v4613_v21 = vmov %v4235_v63 }
 0x24a   : >> { %v1651_v24 = vpop.f32.mrf.mxu0 }
 0x24b   : >> { %v1963_v30 = vadd.f32 %v1925_v14, %v1686_v28  ;;  %v1928_v9 = vpop.f32.mrf.mxu1  ;;  %v4606_v14 = vmov %v4569_v58  ;;  %v4620_v28 = vmov %v4158_v34 }
 0x24d   : >> { %v4326_v2 = vadd.f32 %v2202_v29, %v1963_v30   ;;  %v2205_v53 = vpop.f32.mrf.mxu2  ;;  %v4621_v29 = vld [vmem:[#allocation4_spill] sm:$0xff]  ;;  %v4622_v30 = vld [vmem:[#allocation3_spill] sm:$0xff] }
 0x24e   : >> { %v1374_v13 = vpop.f32.mrf.mxu3 }
 0x24f   : >> { %4582 = vst [vmem:[#allocation6_spill] sm:$0xff] %v4326_v2  ;;  %v1410_v23 = vadd.f32 %v1374_v13, %v4092_v41  ;;  %v4593_v46 = vmov %v4326_v2  ;;  %v4605_v13 = vmov %v4570_v57  ;;  %v3127_v41 = vld [vmem:[%s4553_s2] ss:$0 sm:$0xff] (%p4337_p5) }
 0x250   : >> { %v4594_v2 = vmov %v4593_v46 }
 0x251   : >> { %v1687_v4 = vadd.f32 %v1651_v24, %v1410_v23  ;;  %v4615_v23 = vmov %v4213_v40  ;;  %v4616_v24 = vmov %v4202_v61  ;;  %v2251_v2 = vadd.f32 (%p4337_p5), %v3127_v41, %v4562_v60 }
 0x252   : >> { %v1654_v3 = vpop.f32.mrf.mxu0  ;;  %v2255_v60 = vadd.f32 (%p4337_p5), %v3127_v41, %v4213_v40  ;;  %v2260_v40 = vadd.f32 (%p4337_p5), %v3127_v41, %v4565_v47  ;;  %v2265_v47 = vadd.f32 (%p4337_p5), %v3127_v41, %v4570_v57  ;;  %v2270_v57 = vadd.f32 (%p4337_p5), %v3127_v41, %v4575_v50 }
 0x253   : >> { %v1964_v31 = vadd.f32 %v1928_v9, %v1687_v4  ;;  %v1931_v26 = vpop.f32.mrf.mxu1  ;;  %v4596_v4 = vmov %v4579_v54  ;;  %v4601_v9 = vmov %v4574_v62  ;;  %2284 = vst.msk [vmem:[%s3457_s20 + $0x20] sm:$0xff] (%p4337_p5), %vm339_vm0, %v2251_v2 }
 0x254   : > { %2288 = vst.msk [vmem:[%s3457_s20 + $0x40] sm:$0xff] (%p4337_p5), %vm339_vm0, %v2255_v60 }
 0x255   : >> { %v4329_v1 = vadd.f32 %v2205_v53, %v1964_v31   ;;  %v2208_v8 = vpop.f32.mrf.mxu2  ;;  %v4623_v31 = vld [vmem:[#allocation2_spill] sm:$0xff]  ;;  %2293 = vst.msk [vmem:[%s3457_s20 + $0x68] sm:$0xff] (%p4337_p5), %vm339_vm0, %v2260_v40 }
 0x256   : >> { %v1377_v17 = vpop.f32.mrf.mxu3  ;;  %2298 = vst.msk [vmem:[%s3457_s20 + $0x90] sm:$0xff] (%p4337_p5), %vm339_vm0, %v2265_v47 }
 0x257   : >> { %4584 = vst [vmem:[#allocation7_spill] sm:$0xff] %v4329_v1  ;;  %v1411_v12 = vadd.f32 %v1377_v17, %v4106_v52  ;;  %v4591_v33 = vmov %v4329_v1  ;;  %v4609_v17 = vmov %v4566_v37  ;;  %v4625_v52 = vld [vmem:[#allocation2_spill] sm:$0xff] (%p4337_p5) }
 0x258   : >> { %v4592_v1 = vmov %v4591_v33  ;;  %v2247_v53 = vadd.f32 (%p4337_p5), %v3127_v41, %v4625_v52  ;;  %v4627_v33 = vld [vmem:[#allocation4_spill] sm:$0xff] (%p4337_p5)  ;;  %2303 = vst.msk [vmem:[%s3457_s20 + $0xb8] sm:$0xff] (%p4337_p5), %vm339_vm0, %v2270_v57 }
 0x259   : >> { %v1688_v6 = vadd.f32 %v1654_v3, %v1411_v12  ;;  %v4595_v3 = vmov %v4581_v45  ;;  %v4604_v12 = vmov %v4571_v39  ;;  %v2249_v46 = vadd.f32 (%p4337_p5), %v3127_v41, %v4627_v33 }
 0x25a   : > { %v2250_v45 = vadd.f32 (%p4337_p5), %v3127_v41, %v4158_v34  ;;  %2280 = vst.msk [vmem:[%s3457_s20] sm:$0xff] (%p4337_p5), %vm339_vm0, %v2247_v53  ;;  %v2252_v1 = vadd.f32 (%p4337_p5), %v3127_v41, %v4180_v38  ;;  %v2254_v34 = vadd.f32 (%p4337_p5), %v3127_v41, %v4202_v61  ;;  %v2259_v61 = vadd.f32 (%p4337_p5), %v3127_v41, %v4564_v35 }
 0x25b   : >> { %v1965_v7 = vadd.f32 %v1931_v26, %v1688_v6  ;;  %v4598_v6 = vmov %v4577_v36  ;;  %v4618_v26 = vmov %v4180_v38  ;;  %2282 = vst.msk [vmem:[%s3457_s20 + $0x10] sm:$0xff] (%p4337_p5), %vm339_vm0, %v2249_v46  ;;  %v2256_v38 = vadd.f32 (%p4337_p5), %v3127_v41, %v4563_v42 }
 0x25c   : > { %266 = sbr.rel (!%p4337_p5) target bundleno = 20 (0x14), region = 83  ;;  %2283 = vst.msk [vmem:[%s3457_s20 + $0x18] sm:$0xff] (%p4337_p5), %vm339_vm0, %v2250_v45  ;;  %v2257_v46 = vadd.f32 (%p4337_p5), %v3127_v41, %v4235_v63  ;;  %v2261_v42 = vadd.f32 (%p4337_p5), %v3127_v41, %v4566_v37  ;;  %v2262_v63 = vadd.f32 (%p4337_p5), %v3127_v41, %v4567_v43  ;;  %v2264_v35 = vadd.f32 (%p4337_p5), %v3127_v41, %v4569_v58 }
 0x25d   : >> { %v4332_v0 = vadd.f32 %v2208_v8, %v1965_v7   ;;  %v4599_v7 = vmov %v4576_v44  ;;  %v4600_v8 = vmov %v4575_v50  ;;  %2285 = vst.msk [vmem:[%s3457_s20 + $0x28] sm:$0xff] (%p4337_p5), %vm339_vm0, %v2252_v1  ;;  %v2266_v37 = vadd.f32 (%p4337_p5), %v3127_v41, %v4571_v39  ;;  %v4628_v50 = vld [vmem:[#allocation5_spill] sm:$0xff] (%p4337_p5) }
 0x25e   : > { %2287 = vst.msk [vmem:[%s3457_s20 + $0x38] sm:$0xff] (%p4337_p5), %vm339_vm0, %v2254_v34  ;;  %v2267_v43 = vadd.f32 (%p4337_p5), %v3127_v41, %v4572_v55  ;;  %v2269_v58 = vadd.f32 (%p4337_p5), %v3127_v41, %v4574_v62  ;;  %v2271_v39 = vadd.f32 (%p4337_p5), %v3127_v41, %v4576_v44  ;;  %v2272_v55 = vadd.f32 (%p4337_p5), %v3127_v41, %v4577_v36  ;;  %v4629_v44 = vld [vmem:[#allocation6_spill] sm:$0xff] (%p4337_p5)  ;;  %v4630_v36 = vld [vmem:[#allocation7_spill] sm:$0xff] (%p4337_p5) }
 0x25f   : >> { %4586 = vst [vmem:[#allocation8_spill] sm:$0xff] %v4332_v0  ;;  %v4589_v32 = vmov %v4332_v0  ;;  %v2274_v62 = vadd.f32 (%p4337_p5), %v3127_v41, %v4579_v54  ;;  %v2275_v18 = vadd.f32 (%p4337_p5), %v3127_v41, %v4628_v50  ;;  %v2276_v20 = vadd.f32 (%p4337_p5), %v3127_v41, %v4629_v44 }
 0x260   : >> { %v4590_v0 = vmov %v4589_v32  ;;  %v4626_v32 = vld [vmem:[#allocation3_spill] sm:$0xff] (%p4337_p5)  ;;  %2289 = vst.msk [vmem:[%s3457_s20 + $0x48] sm:$0xff] (%p4337_p5), %vm339_vm0, %v2256_v38  ;;  %v2277_v19 = vadd.f32 (%p4337_p5), %v3127_v41, %v4630_v36 }
 0x261   : > { %v2248_v31 = vadd.f32 %v3127_v41, %v4626_v32  ;;  %v2253_v32 = vadd.f32 %v3127_v41, %v4191_v49  ;;  %v2258_v49 = vadd.f32 %v3127_v41, %v4246_v48  ;;  %2290 = vst.msk [vmem:[%s3457_s20 + $0x50] sm:$0xff] %vm339_vm0, %v2257_v46  ;;  %v2263_v48 = vadd.f32 %v3127_v41, %v4568_v51 }
 0x262   : > { %2292 = vst.msk [vmem:[%s3457_s20 + $0x60] sm:$0xff] %vm339_vm0, %v2259_v61  ;;  %v2268_v51 = vadd.f32 %v3127_v41, %v4573_v56  ;;  %v2273_v56 = vadd.f32 %v3127_v41, %v4578_v59 }
 0x263   : > { %2281 = vst.msk [vmem:[%s3457_s20 + $0x8] sm:$0xff] %vm339_vm0, %v2248_v31 }
 0x264   : > { %2286 = vst.msk [vmem:[%s3457_s20 + $0x30] sm:$0xff] %vm339_vm0, %v2253_v32 }
 0x265   : > { %2291 = vst.msk [vmem:[%s3457_s20 + $0x58] sm:$0xff] %vm339_vm0, %v2258_v49 }
 0x266   : > { %2294 = vst.msk [vmem:[%s3457_s20 + $0x70] sm:$0xff] %vm339_vm0, %v2261_v42  ;;  %v4631_v11 = vld [vmem:[#allocation8_spill] sm:$0xff] }
 0x267   : > { %2295 = vst.msk [vmem:[%s3457_s20 + $0x78] sm:$0xff] %vm339_vm0, %v2262_v63  ;;  %v2278_v59 = vadd.f32 %v3127_v41, %v4631_v11 }
 0x268   : > { %2296 = vst.msk [vmem:[%s3457_s20 + $0x80] sm:$0xff] %vm339_vm0, %v2263_v48 }
 0x269   : > { %2297 = vst.msk [vmem:[%s3457_s20 + $0x88] sm:$0xff] %vm339_vm0, %v2264_v35 }
 0x26a   : > { %2299 = vst.msk [vmem:[%s3457_s20 + $0x98] sm:$0xff] %vm339_vm0, %v2266_v37 }
 0x26b   : > { %2300 = vst.msk [vmem:[%s3457_s20 + $0xa0] sm:$0xff] %vm339_vm0, %v2267_v43 }
 0x26c   : > { %2301 = vst.msk [vmem:[%s3457_s20 + $0xa8] sm:$0xff] %vm339_vm0, %v2268_v51 }
 0x26d   : > { %2302 = vst.msk [vmem:[%s3457_s20 + $0xb0] sm:$0xff] %vm339_vm0, %v2269_v58 }
 0x26e   : > { %2304 = vst.msk [vmem:[%s3457_s20 + $0xc0] sm:$0xff] %vm339_vm0, %v2271_v39 }
 0x26f   : > { %2305 = vst.msk [vmem:[%s3457_s20 + $0xc8] sm:$0xff] %vm339_vm0, %v2272_v55 }
 0x270   : > { %2306 = vst.msk [vmem:[%s3457_s20 + $0xd0] sm:$0xff] %vm339_vm0, %v2273_v56 }
 0x271   : > { %2307 = vst.msk [vmem:[%s3457_s20 + $0xd8] sm:$0xff] %vm339_vm0, %v2274_v62 }
 0x272   : > { %2308 = vst.msk [vmem:[%s3457_s20 + $0xe0] sm:$0xff] %vm339_vm0, %v2275_v18 }
 0x273   : > { %2309 = vst.msk [vmem:[%s3457_s20 + $0xe8] sm:$0xff] %vm339_vm0, %v2276_v20 }
 0x274   : > { %2310 = vst.msk [vmem:[%s3457_s20 + $0xf0] sm:$0xff] %vm339_vm0, %v2277_v19 }
 0x275   : > { %2311 = vst.msk [vmem:[%s3457_s20 + $0xf8] sm:$0xff] %vm339_vm0, %v2278_v59 }
 0x276 PF: > { %s13_s14 = sadd.s32 1, %s3282_s14   ;;  %s4632_s12 = smov %s3278_s13 }
 0x277   : > { %p10_p6 = scmp.ge.s32.totalorder %s13_s14, 4   ;;  %s4633_s13 = smov %s4635_s15 }
 0x279   :  { %12 = sbr.rel (!%p10_p6) target bundleno = 2 (0x2), region = 94 }

</bundles_post_ra>
